<compile_context>
chip_gen: v7x
topology: tpu7x:2x2x1
jax: 0.10.0
libtpu: 0.0.40
codegen_flags: <defaults>
</compile_context>

<pallas_src>
import functools

import jax
import jax.numpy as jnp
import numpy as np
from jax.experimental import pallas as pl
from jax.experimental.pallas import tpu as pltpu

NEG_SLOPE = 0.01  # nn.LeakyReLU default


def _leaky(x):
    # For slope < 1: max(x, slope*x) == LeakyReLU(x).
    return jnp.maximum(x, NEG_SLOPE * x)


def _largest_divisor_leq(n, cap):
    cap = max(1, min(n, cap))
    for d in range(cap, 0, -1):
        if n % d == 0:
            return d
    return 1


def _tpu_config():
    """Generation-aware defaults: elementwise dtype, VMEM budget, tiling caps."""
    kind = ""
    try:
        dev = jax.devices()[0]
        if dev.platform == "tpu":
            kind = dev.device_kind.lower()
    except Exception:
        kind = ""
    is_v7 = ("v7" in kind) or ("7x" in kind)
    is_v6 = "v6" in kind
    is_v5e = ("v5e" in kind) or ("v5 lite" in kind) or ("v5litepod" in kind)
    is_other_big_vmem = ("v5p" in kind) or ("v4" in kind)
    if is_v7:
        # 2 TensorCores/chip, 64 MiB VMEM per core: keep headroom, allow batch split.
        return dict(ew_dtype=jnp.bfloat16, vmem_limit=48 * 1024 * 1024,
                    max_pair_rows=16384, two_cores=True)
    if is_v6:
        # 128 MiB VMEM, single TC, native bf16 VALU.
        return dict(ew_dtype=jnp.bfloat16, vmem_limit=64 * 1024 * 1024,
                    max_pair_rows=32768, two_cores=False)
    if is_v5e or is_other_big_vmem:
        # No native bf16 VALU -> keep the elementwise slabs in f32.
        return dict(ew_dtype=jnp.float32, vmem_limit=64 * 1024 * 1024,
                    max_pair_rows=32768, two_cores=False)
    # Unknown / older chips: conservative defaults.
    return dict(ew_dtype=jnp.float32, vmem_limit=32 * 1024 * 1024,
                max_pair_rows=8192, two_cores=False)


def _vmem_bytes_estimate(Bb, tile_i, L, c1, U, ew_bytes):
    """Rough upper bound on the per-step VMEM working set."""
    P = Bb * tile_i * L
    # Big slabs: h1 (ew), h2 f32 MXU result, h2 (ew) after bias+leaky.
    slabs = P * U * (2 * ew_bytes + 4)
    if ew_bytes == 4:
        slabs += 2 * P * U * 2          # extra bf16 copies fed to the MXU
    scratch = 2 * Bb * L * U * ew_bytes + Bb * U * 4
    io = 2 * (Bb * L * c1 * 2 + Bb * P * 2 + Bb * U * 4)   # double-buffered blocks
    weights = c1 * 2 * U * 2 + U * U * (2 + 4 + 4) + 8 * U * 4
    return slabs + scratch + io + weights + (512 << 10)


def _choose_tiling(b, L, c1, U, ew_dtype, max_pair_rows, vmem_limit, two_cores,
                   block_b=None):
    """Pick (batch block, i-tile) that respect max_pair_rows AND the VMEM budget."""
    ew_bytes = jnp.dtype(ew_dtype).itemsize
    budget = int(0.7 * (vmem_limit if vmem_limit else 32 * 1024 * 1024))

    def fits(bb, ti):
        return _vmem_bytes_estimate(bb, ti, L, c1, U, ew_bytes) <= budget

    if block_b is not None:
        if b % block_b != 0:
            raise ValueError(f"block_b={block_b} must divide batch={b}")
        bb0 = block_b
    elif two_cores and b >= 2 and (b // 2) * L * L >= 4096:
        # v7x: split the "parallel" batch axis over the 2 TensorCores only when
        # each core gets enough pair-rows to amortize per-grid-step overhead.
        bb0 = _largest_divisor_leq(b, b // 2)
    else:
        bb0 = b

    bb_cands = []
    bb = bb0
    while bb >= 1:
        bb_cands.append(bb)
        if bb == 1:
            break
        bb = _largest_divisor_leq(b, max(1, bb // 2))

    divisors = [t for t in range(L, 0, -1) if L % t == 0]
    for Bb in bb_cands:
        cap = max(1, max_pair_rows // max(1, Bb * L))
        for aligned_only in (True, False):
            for t in divisors:
                if t > cap:
                    continue
                if aligned_only and t % 8 != 0 and t != L:
                    continue            # prefer sublane-aligned (x8) i-tiles
                if fits(Bb, t):
                    return Bb, t
    # TODO(synk): also tile the j axis for very large feature maps.
    raise ValueError(
        "BatchRelationalModule Pallas kernel: feature map too large for the "
        "VMEM budget even at tile_i=1; j-axis tiling is not implemented.")


def _relational_kernel(feat_ref, w1cat_ref, b1pad_ref, w2_ref, b2_ref, sel_ref,
                       wp_ref, bp_ref, wo_ref, bo_ref,
                       out_ref, a_ref, bsc_ref, acc_ref, *, tile_i, ew_dtype):
    it = pl.program_id(1)
    n_it = pl.num_programs(1)

    Bb, L, c1 = feat_ref.shape
    U = w2_ref.shape[1]

    # ---- per-batch-block invariant work, hoisted to the first i-tile --------
    @pl.when(it == 0)
    def _init():
        # g-MLP layer 1 for ALL locations at once, lane-dense (N = 2U = 128):
        #   ab[b, l, :U] = feat[b, l] @ W1[:c1] + b1   ("x_i" half, indexed by j)
        #   ab[b, l, U:] = feat[b, l] @ W1[c1:]        ("x_j" half, indexed by i)
        ab = jnp.dot(feat_ref[...].reshape(Bb * L, c1), w1cat_ref[...],
                     preferred_element_type=jnp.float32).reshape(Bb, L, 2 * U)
        ab = ab + b1pad_ref[...]          # folds b1 into the "x_i" half only
        a_ref[...] = ab[:, :, :U].astype(ew_dtype)
        bsc_ref[...] = ab[:, :, U:].astype(ew_dtype)
        acc_ref[...] = jnp.zeros_like(acc_ref)

    # ---- pair features for this i-tile, formed algebraically in VMEM --------
    i0 = it * tile_i
    if tile_i % 8 == 0:
        i0 = pl.multiple_of(i0, 8)
    A = a_ref[...].reshape(Bb, 1, L, U)                              # per-j (+b1)
    B = bsc_ref[:, pl.ds(i0, tile_i), :].reshape(Bb, tile_i, 1, U)   # per-i
    h1 = _leaky(A + B)                                 # (Bb, tile_i, L, U) ew

    # ---- g-MLP layer 2 on the MXU (bf16 operands, f32 accumulation) ---------
    P = Bb * tile_i * L
    h2 = jnp.dot(h1.reshape(P, U).astype(jnp.bfloat16), w2_ref[...],
                 preferred_element_type=jnp.float32)                 # (P, U) f32
    h2 = _leaky(h2.astype(ew_dtype) + b2_ref[...].astype(ew_dtype))

    # ---- pair-sum on the MXU via the precomputed block-diagonal selector ----
    acc_ref[...] += jnp.dot(sel_ref[...], h2.astype(jnp.bfloat16),
                            preferred_element_type=jnp.float32)      # (Bb, U)

    # ---- f-network (f32), once per batch block ------------------------------
    @pl.when(it == n_it - 1)
    def _finalize():
        s = acc_ref[...]
        p = _leaky(jnp.dot(s, wp_ref[...],
                           preferred_element_type=jnp.float32) + bp_ref[...])
        o = _leaky(jnp.dot(p, wo_ref[...],
                           preferred_element_type=jnp.float32) + bo_ref[...])
        out_ref[...] = o.astype(out_ref.dtype)


def _build_feat(x, use_coordinates=True):
    b, c, h, w = x.shape
    L = h * w
    feat = x.reshape(b, c, L).transpose(0, 2, 1)              # (b, L, c)
    if use_coordinates:
        coords = jnp.broadcast_to(
            jnp.arange(L, dtype=x.dtype)[None, :, None], (b, L, 1))
        feat = jnp.concatenate([feat, coords], axis=2)        # (b, L, c+1)
    return feat


def batch_relational_forward(x, params, *, use_coordinates=True, num_units=64,
                             max_pair_rows=None, block_b=None, ew_dtype=None,
                             vmem_limit_bytes=None):
    """x: (b, c, h, w) float32 NCHW. Returns (b, num_units) float32."""
    cfg = _tpu_config()
    if ew_dtype is None:
        ew_dtype = cfg["ew_dtype"]
    if max_pair_rows is None:
        max_pair_rows = cfg["max_pair_rows"]
    if vmem_limit_bytes is None:
        vmem_limit_bytes = cfg["vmem_limit"]

    b = x.shape[0]
    feat = _build_feat(x, use_coordinates)                    # (b, L, c1) f32
    _, L, c1 = feat.shape
    U = num_units

    (w1, b1, w2, b2, wp, bp, wo, bo) = params
    # bf16 MXU operands (f32 accumulation inside the kernel).
    feat_bf = feat.astype(jnp.bfloat16)
    # Lane-dense layer-1 weight: [:, :U] multiplies feat[j] ("x_i" half),
    # [:, U:] multiplies feat[i] ("x_j" half).
    w1cat = jnp.concatenate([w1[:c1], w1[c1:]], axis=1).astype(jnp.bfloat16)
    b1pad = jnp.concatenate([b1, jnp.zeros_like(b1)], axis=1)   # (1, 2U) f32
    w2_bf = w2.astype(jnp.bfloat16)

    Bb, tile_i = _choose_tiling(b, L, c1, U, ew_dtype, max_pair_rows,
                                vmem_limit_bytes, cfg["two_cores"], block_b)
    grid = (b // Bb, L // tile_i)
    P = Bb * tile_i * L

    # Precomputed block-diagonal 0/1 selector for the pair-sum (MXU reduce with
    # f32 accumulation); built host-side so there is no per-step iota/compare.
    if Bb == 1:
        sel = jnp.ones((1, P), dtype=jnp.bfloat16)
    else:
        per = tile_i * L
        sel_np = (np.arange(P)[None, :] // per) == np.arange(Bb)[:, None]
        sel = jnp.asarray(sel_np, dtype=jnp.bfloat16)

    kernel = functools.partial(_relational_kernel, tile_i=tile_i,
                               ew_dtype=ew_dtype)

    grid_spec = pltpu.PrefetchScalarGridSpec(
        num_scalar_prefetch=0,
        grid=grid,
        in_specs=[
            pl.BlockSpec((Bb, L, c1), lambda ib, it: (ib, 0, 0)),   # feat
            pl.BlockSpec((c1, 2 * U), lambda ib, it: (0, 0)),       # w1cat
            pl.BlockSpec((1, 2 * U), lambda ib, it: (0, 0)),        # b1pad
            pl.BlockSpec((U, U), lambda ib, it: (0, 0)),            # w2
            pl.BlockSpec((1, U), lambda ib, it: (0, 0)),            # b2
            pl.BlockSpec((Bb, P), lambda ib, it: (0, 0)),           # sel
            pl.BlockSpec((U, U), lambda ib, it: (0, 0)),            # wp
            pl.BlockSpec((1, U), lambda ib, it: (0, 0)),            # bp
            pl.BlockSpec((U, U), lambda ib, it: (0, 0)),            # wo
            pl.BlockSpec((1, U), lambda ib, it: (0, 0)),            # bo
        ],
        out_specs=pl.BlockSpec((Bb, U), lambda ib, it: (ib, 0)),
        scratch_shapes=[
            pltpu.VMEM((Bb, L, U), ew_dtype),     # layer-1 "x_i" half (+ b1)
            pltpu.VMEM((Bb, L, U), ew_dtype),     # layer-1 "x_j" half
            pltpu.VMEM((Bb, U), jnp.float32),     # pair-sum accumulator
        ],
    )

    out = pl.pallas_call(
        kernel,
        out_shape=jax.ShapeDtypeStruct((b, U), jnp.float32),
        grid_spec=grid_spec,
        compiler_params=pltpu.CompilerParams(
            dimension_semantics=("parallel", "arbitrary"),
            vmem_limit_bytes=vmem_limit_bytes),
    )(feat_bf, w1cat, b1pad, w2_bf, b2, sel, wp, bp, wo, bo)
    return out


def init_params(key, in_features, num_units=64):
    """Deterministic synthetic parameters (PyTorch-Linear-style uniform init)."""
    def linear(k, fan_in, fan_out):
        k1, k2 = jax.random.split(k)
        bound = 1.0 / np.sqrt(fan_in)
        w = jax.random.uniform(k1, (fan_in, fan_out), jnp.float32, -bound, bound)
        bb = jax.random.uniform(k2, (1, fan_out), jnp.float32, -bound, bound)
        return w, bb

    ks = jax.random.split(key, 4)
    w1, b1 = linear(ks[0], in_features, num_units)   # g_fcc_0
    w2, b2 = linear(ks[1], num_units, num_units)     # g_fcc_1
    wp, bp = linear(ks[2], num_units, num_units)     # post_processing_layer
    wo, bo = linear(ks[3], num_units, num_units)     # output_layer
    return (w1, b1, w2, b2, wp, bp, wo, bo)


def reference_forward(x, params, *, use_coordinates=True, num_units=64):
    """Pure-f32 jnp reference matching the PyTorch module semantics."""
    feat = _build_feat(x, use_coordinates)
    b, L, c1 = feat.shape
    x_i = jnp.broadcast_to(feat[:, None, :, :], (b, L, L, c1))
    x_j = jnp.broadcast_to(feat[:, :, None, :], (b, L, L, c1))
    pairs = jnp.concatenate([x_i, x_j], axis=3).reshape(b * L * L, 2 * c1)
    (w1, b1, w2, b2, wp, bp, wo, bo) = params
    out = _leaky(pairs @ w1 + b1)
    out = _leaky(out @ w2 + b2)
    out = out.reshape(b, L, L, num_units).sum(axis=(1, 2))
    out = _leaky(out @ wp + bp)
    out = _leaky(out @ wo + bo)
    return out


def matched_precision_reference(x, params, *, use_coordinates=True, num_units=64,
                                ew_dtype=None):
    """jnp reference using the same dtype casts as the kernel (tight check)."""
    if ew_dtype is None:
        ew_dtype = _tpu_config()["ew_dtype"]
    feat = _build_feat(x, use_coordinates)
    b, L, c1 = feat.shape
    U = num_units
    (w1, b1, w2, b2, wp, bp, wo, bo) = params
    featb = feat.astype(jnp.bfloat16)
    w1cat = jnp.concatenate([w1[:c1], w1[c1:]], axis=1).astype(jnp.bfloat16)
    b1pad = jnp.concatenate([b1, jnp.zeros_like(b1)], axis=1)
    ab = jnp.einsum('blc,cu->blu', featb, w1cat,
                    preferred_element_type=jnp.float32) + b1pad
    ab = ab.astype(ew_dtype)
    A = ab[:, :, :U]                                   # indexed by j
    B = ab[:, :, U:]                                   # indexed by i
    h1 = _leaky(A[:, None, :, :] + B[:, :, None, :])   # (b, i, j, U)
    h2 = jnp.einsum('bijk,kl->bijl', h1.astype(jnp.bfloat16),
                    w2.astype(jnp.bfloat16),
                    preferred_element_type=jnp.float32)
    h2 = _leaky(h2.astype(ew_dtype) + b2.astype(ew_dtype))
    s = h2.astype(jnp.bfloat16).astype(jnp.float32).sum(axis=(1, 2))
    p = _leaky(s @ wp + bp)
    return _leaky(p @ wo + bo)


if __name__ == "__main__":
    # input_shape = (b, c, h, w) -> length = h*w = 16, g-input = 2*(c+1) = 10
    b, c, h, w = 2, 4, 4, 4
    num_units = 64

    key = jax.random.PRNGKey(0)
    k_x, k_p = jax.random.split(key)
    x = jax.random.normal(k_x, (b, c, h, w), dtype=jnp.float32)
    params = init_params(k_p, in_features=2 * (c + 1), num_units=num_units)

    fwd = jax.jit(functools.partial(batch_relational_forward,
                                    use_coordinates=True, num_units=num_units))
    out = fwd(x, params)
    jax.block_until_ready(out)

    # Tight check: jnp reference with the same reduced-precision casts.
    ref_bf = matched_precision_reference(x, params, num_units=num_units)
    np.testing.assert_allclose(np.asarray(out), np.asarray(ref_bf),
                               rtol=2e-2, atol=1e-1)

    # Loose check against the pure-f32 semantic reference (the g-MLP runs in
    # bf16 on the MXU inside the kernel, so bf16-level tolerance is expected).
    ref_f32 = reference_forward(x, params, num_units=num_units)
    np.testing.assert_allclose(np.asarray(out), np.asarray(ref_f32),
                               rtol=5e-2, atol=2.0)

    # Exercise the i-tiled accumulator path (multiple "arbitrary" grid steps
    # with pl.when init/finalize), with sublane-aligned i-tiles.
    fwd_tiled = jax.jit(functools.partial(batch_relational_forward,
                                          use_coordinates=True,
                                          num_units=num_units,
                                          max_pair_rows=256))
    out_tiled = fwd_tiled(x, params)
    jax.block_until_ready(out_tiled)
    np.testing.assert_allclose(np.asarray(out_tiled), np.asarray(ref_bf),
                               rtol=2e-2, atol=1e-1)

    # Exercise multiple batch blocks on the "parallel" axis plus i-tiling
    # (the per-batch-block pl.when(it==0) re-initialization path).
    fwd_split = jax.jit(functools.partial(batch_relational_forward,
                                          use_coordinates=True,
                                          num_units=num_units,
                                          block_b=1, max_pair_rows=128))
    out_split = fwd_split(x, params)
    jax.block_until_ready(out_split)
    np.testing.assert_allclose(np.asarray(out_split), np.asarray(ref_bf),
                               rtol=2e-2, atol=1e-1)

    print("KERNEL_OK")
</pallas_src>

<mosaic_0001>
module attributes {stable_mosaic.version = 11 : i64} {
  func.func @_relational_kernel(%arg0: i32, %arg1: i32, %arg2: memref<2x16x5xbf16, #tpu.memory_space<vmem>>, %arg3: memref<5x128xbf16, #tpu.memory_space<vmem>>, %arg4: memref<1x128xf32, #tpu.memory_space<vmem>>, %arg5: memref<64x64xbf16, #tpu.memory_space<vmem>>, %arg6: memref<1x64xf32, #tpu.memory_space<vmem>>, %arg7: memref<2x512xbf16, #tpu.memory_space<vmem>>, %arg8: memref<64x64xf32, #tpu.memory_space<vmem>>, %arg9: memref<1x64xf32, #tpu.memory_space<vmem>>, %arg10: memref<64x64xf32, #tpu.memory_space<vmem>>, %arg11: memref<1x64xf32, #tpu.memory_space<vmem>>, %arg12: memref<2x64xf32, #tpu.memory_space<vmem>>, %arg13: memref<2x16x64xf32, #tpu.memory_space<vmem>>, %arg14: memref<2x16x64xf32, #tpu.memory_space<vmem>>, %arg15: memref<2x64xf32, #tpu.memory_space<vmem>>) attributes {dimension_semantics = [#tpu.dimension_semantics<parallel>, #tpu.dimension_semantics<arbitrary>], iteration_bounds = array<i64: 1, 1>, scalar_prefetch = 0 : i64, scratch_operands = 3 : i64, tpu.core_type = #tpu.core_type<tc>, window_params = [{transform_indices = @transform_0, window_bounds = array<i64: 2, 16, 5>}, {pipeline_mode = #tpu.pipeline_mode<synchronous>, transform_indices = @transform_1, window_bounds = array<i64: 5, 128>}, {pipeline_mode = #tpu.pipeline_mode<synchronous>, transform_indices = @transform_2, window_bounds = array<i64: 1, 128>}, {pipeline_mode = #tpu.pipeline_mode<synchronous>, transform_indices = @transform_3, window_bounds = array<i64: 64, 64>}, {pipeline_mode = #tpu.pipeline_mode<synchronous>, transform_indices = @transform_4, window_bounds = array<i64: 1, 64>}, {pipeline_mode = #tpu.pipeline_mode<synchronous>, transform_indices = @transform_5, window_bounds = array<i64: 2, 512>}, {pipeline_mode = #tpu.pipeline_mode<synchronous>, transform_indices = @transform_6, window_bounds = array<i64: 64, 64>}, {pipeline_mode = #tpu.pipeline_mode<synchronous>, transform_indices = @transform_7, window_bounds = array<i64: 1, 64>}, {pipeline_mode = #tpu.pipeline_mode<synchronous>, transform_indices = @transform_8, window_bounds = array<i64: 64, 64>}, {pipeline_mode = #tpu.pipeline_mode<synchronous>, transform_indices = @transform_9, window_bounds = array<i64: 1, 64>}, {transform_indices = @transform_10, window_bounds = array<i64: 2, 64>}]} {
    %c0_i32 = arith.constant 0 : i32
    %0 = arith.cmpi eq, %arg1, %c0_i32 : i32
    %1 = arith.extui %0 : i1 to i32
    %c0_i32_0 = arith.constant 0 : i32
    %2 = arith.cmpi ne, %1, %c0_i32_0 : i32
    scf.if %2 {
      %c0_20 = arith.constant 0 : index
      %c0_21 = arith.constant 0 : index
      %c0_22 = arith.constant 0 : index
      %35 = vector.load %arg2[%c0_20, %c0_21, %c0_22] : memref<2x16x5xbf16, #tpu.memory_space<vmem>>, vector<2x16x5xbf16>
      %36 = vector.shape_cast %35 : vector<2x16x5xbf16> to vector<32x5xbf16>
      %c0_23 = arith.constant 0 : index
      %c0_24 = arith.constant 0 : index
      %37 = vector.load %arg3[%c0_23, %c0_24] : memref<5x128xbf16, #tpu.memory_space<vmem>>, vector<5x128xbf16>
      %cst_25 = arith.constant dense<0.000000e+00> : vector<32x128xf32>
      %38 = tpu.matmul %36, %37, %cst_25 {dimension_numbers = #tpu.dot_dimension_numbers<[1], [0], [0], [1], [0, 0, 1, 1], [], []>} : vector<32x5xbf16>, vector<5x128xbf16>, vector<32x128xf32> -> vector<32x128xf32>
      %39 = vector.shape_cast %38 : vector<32x128xf32> to vector<2x16x128xf32>
      %c0_26 = arith.constant 0 : index
      %c0_27 = arith.constant 0 : index
      %40 = vector.load %arg4[%c0_26, %c0_27] : memref<1x128xf32, #tpu.memory_space<vmem>>, vector<1x128xf32>
      %41 = vector.shape_cast %40 : vector<1x128xf32> to vector<1x1x128xf32>
      %42 = vector.broadcast %41 : vector<1x1x128xf32> to vector<2x16x128xf32>
      %43 = arith.addf %39, %42 : vector<2x16x128xf32>
      %44 = vector.extract_strided_slice %43 {offsets = [0, 0, 0], sizes = [2, 16, 64], strides = [1, 1, 1]} : vector<2x16x128xf32> to vector<2x16x64xf32>
      %c0_28 = arith.constant 0 : index
      %c0_29 = arith.constant 0 : index
      %c0_30 = arith.constant 0 : index
      %45 = vector.load %arg13[%c0_28, %c0_29, %c0_30] : memref<2x16x64xf32, #tpu.memory_space<vmem>>, vector<2x16x64xf32>
      tpu.vector_store %arg13[%c0_28, %c0_29, %c0_30], %44 {strides = array<i32>} : memref<2x16x64xf32, #tpu.memory_space<vmem>>, vector<2x16x64xf32>,
      %46 = vector.extract_strided_slice %43 {offsets = [0, 0, 64], sizes = [2, 16, 64], strides = [1, 1, 1]} : vector<2x16x128xf32> to vector<2x16x64xf32>
      %c0_31 = arith.constant 0 : index
      %c0_32 = arith.constant 0 : index
      %c0_33 = arith.constant 0 : index
      %47 = vector.load %arg14[%c0_31, %c0_32, %c0_33] : memref<2x16x64xf32, #tpu.memory_space<vmem>>, vector<2x16x64xf32>
      tpu.vector_store %arg14[%c0_31, %c0_32, %c0_33], %46 {strides = array<i32>} : memref<2x16x64xf32, #tpu.memory_space<vmem>>, vector<2x16x64xf32>,
      %cst_34 = arith.constant 0.000000e+00 : f32
      %48 = vector.broadcast %cst_34 : f32 to vector<2x64xf32>
      %c0_35 = arith.constant 0 : index
      %c0_36 = arith.constant 0 : index
      %49 = vector.load %arg15[%c0_35, %c0_36] : memref<2x64xf32, #tpu.memory_space<vmem>>, vector<2x64xf32>
      tpu.vector_store %arg15[%c0_35, %c0_36], %48 {strides = array<i32>} : memref<2x64xf32, #tpu.memory_space<vmem>>, vector<2x64xf32>,
    } else {
    }
    %c16_i32 = arith.constant 16 : i32
    %3 = arith.muli %arg1, %c16_i32 : i32
    %4 = tpu.assume_multiple %3, 8 : i32
    %c0 = arith.constant 0 : index
    %c0_1 = arith.constant 0 : index
    %c0_2 = arith.constant 0 : index
    %5 = vector.load %arg13[%c0, %c0_1, %c0_2] : memref<2x16x64xf32, #tpu.memory_space<vmem>>, vector<2x16x64xf32>
    %6 = vector.shape_cast %5 : vector<2x16x64xf32> to vector<2x1x16x64xf32>
    %c0_3 = arith.constant 0 : index
    %7 = arith.index_cast %4 : i32 to index
    %c0_4 = arith.constant 0 : index
    %8 = vector.load %arg14[%c0_3, %7, %c0_4] : memref<2x16x64xf32, #tpu.memory_space<vmem>>, vector<2x16x64xf32>
    %9 = vector.shape_cast %8 : vector<2x16x64xf32> to vector<2x16x1x64xf32>
    %10 = vector.broadcast %6 : vector<2x1x16x64xf32> to vector<2x16x16x64xf32>
    %11 = vector.broadcast %9 : vector<2x16x1x64xf32> to vector<2x16x16x64xf32>
    %12 = arith.addf %10, %11 : vector<2x16x16x64xf32>
    %cst = arith.constant 0.00999999977 : f32
    %13 = vector.broadcast %cst : f32 to vector<2x16x16x64xf32>
    %14 = arith.mulf %13, %12 : vector<2x16x16x64xf32>
    %15 = arith.maximumf %12, %14 : vector<2x16x16x64xf32>
    %16 = vector.shape_cast %15 : vector<2x16x16x64xf32> to vector<512x64xf32>
    %17 = arith.truncf %16 : vector<512x64xf32> to vector<512x64xbf16>
    %c0_5 = arith.constant 0 : index
    %c0_6 = arith.constant 0 : index
    %18 = vector.load %arg5[%c0_5, %c0_6] : memref<64x64xbf16, #tpu.memory_space<vmem>>, vector<64x64xbf16>
    %cst_7 = arith.constant dense<0.000000e+00> : vector<512x64xf32>
    %19 = tpu.matmul %17, %18, %cst_7 {dimension_numbers = #tpu.dot_dimension_numbers<[1], [0], [0], [1], [0, 0, 1, 1], [], []>} : vector<512x64xbf16>, vector<64x64xbf16>, vector<512x64xf32> -> vector<512x64xf32>
    %c0_8 = arith.constant 0 : index
    %c0_9 = arith.constant 0 : index
    %20 = vector.load %arg6[%c0_8, %c0_9] : memref<1x64xf32, #tpu.memory_space<vmem>>, vector<1x64xf32>
    %21 = vector.broadcast %20 : vector<1x64xf32> to vector<512x64xf32>
    %22 = arith.addf %19, %21 : vector<512x64xf32>
    %cst_10 = arith.constant 0.00999999977 : f32
    %23 = vector.broadcast %cst_10 : f32 to vector<512x64xf32>
    %24 = arith.mulf %23, %22 : vector<512x64xf32>
    %25 = arith.maximumf %22, %24 : vector<512x64xf32>
    %c0_11 = arith.constant 0 : index
    %c0_12 = arith.constant 0 : index
    %26 = vector.load %arg15[%c0_11, %c0_12] : memref<2x64xf32, #tpu.memory_space<vmem>>, vector<2x64xf32>
    %c0_13 = arith.constant 0 : index
    %c0_14 = arith.constant 0 : index
    %27 = vector.load %arg7[%c0_13, %c0_14] : memref<2x512xbf16, #tpu.memory_space<vmem>>, vector<2x512xbf16>
    %28 = arith.truncf %25 : vector<512x64xf32> to vector<512x64xbf16>
    %cst_15 = arith.constant dense<0.000000e+00> : vector<2x64xf32>
    %29 = tpu.matmul %27, %28, %cst_15 {dimension_numbers = #tpu.dot_dimension_numbers<[1], [0], [0], [1], [0, 0, 1, 1], [], []>} : vector<2x512xbf16>, vector<512x64xbf16>, vector<2x64xf32> -> vector<2x64xf32>
    %30 = arith.addf %26, %29 : vector<2x64xf32>
    %c0_16 = arith.constant 0 : index
    %c0_17 = arith.constant 0 : index
    %31 = vector.load %arg15[%c0_16, %c0_17] : memref<2x64xf32, #tpu.memory_space<vmem>>, vector<2x64xf32>
    tpu.vector_store %arg15[%c0_16, %c0_17], %30 {strides = array<i32>} : memref<2x64xf32, #tpu.memory_space<vmem>>, vector<2x64xf32>,
    %c0_i32_18 = arith.constant 0 : i32
    %32 = arith.cmpi eq, %arg1, %c0_i32_18 : i32
    %33 = arith.extui %32 : i1 to i32
    %c0_i32_19 = arith.constant 0 : i32
    %34 = arith.cmpi ne, %33, %c0_i32_19 : i32
    scf.if %34 {
      %c0_20 = arith.constant 0 : index
      %c0_21 = arith.constant 0 : index
      %35 = vector.load %arg15[%c0_20, %c0_21] : memref<2x64xf32, #tpu.memory_space<vmem>>, vector<2x64xf32>
      %c0_22 = arith.constant 0 : index
      %c0_23 = arith.constant 0 : index
      %36 = vector.load %arg8[%c0_22, %c0_23] : memref<64x64xf32, #tpu.memory_space<vmem>>, vector<64x64xf32>
      %cst_24 = arith.constant dense<0.000000e+00> : vector<2x64xf32>
      %37 = tpu.matmul %35, %36, %cst_24 {dimension_numbers = #tpu.dot_dimension_numbers<[1], [0], [0], [1], [0, 0, 1, 1], [], []>} : vector<2x64xf32>, vector<64x64xf32>, vector<2x64xf32> -> vector<2x64xf32>
      %c0_25 = arith.constant 0 : index
      %c0_26 = arith.constant 0 : index
      %38 = vector.load %arg9[%c0_25, %c0_26] : memref<1x64xf32, #tpu.memory_space<vmem>>, vector<1x64xf32>
      %39 = vector.broadcast %38 : vector<1x64xf32> to vector<2x64xf32>
      %40 = arith.addf %37, %39 : vector<2x64xf32>
      %cst_27 = arith.constant 0.00999999977 : f32
      %41 = vector.broadcast %cst_27 : f32 to vector<2x64xf32>
      %42 = arith.mulf %41, %40 : vector<2x64xf32>
      %43 = arith.maximumf %40, %42 : vector<2x64xf32>
      %c0_28 = arith.constant 0 : index
      %c0_29 = arith.constant 0 : index
      %44 = vector.load %arg10[%c0_28, %c0_29] : memref<64x64xf32, #tpu.memory_space<vmem>>, vector<64x64xf32>
      %cst_30 = arith.constant dense<0.000000e+00> : vector<2x64xf32>
      %45 = tpu.matmul %43, %44, %cst_30 {dimension_numbers = #tpu.dot_dimension_numbers<[1], [0], [0], [1], [0, 0, 1, 1], [], []>} : vector<2x64xf32>, vector<64x64xf32>, vector<2x64xf32> -> vector<2x64xf32>
      %c0_31 = arith.constant 0 : index
      %c0_32 = arith.constant 0 : index
      %46 = vector.load %arg11[%c0_31, %c0_32] : memref<1x64xf32, #tpu.memory_space<vmem>>, vector<1x64xf32>
      %47 = vector.broadcast %46 : vector<1x64xf32> to vector<2x64xf32>
      %48 = arith.addf %45, %47 : vector<2x64xf32>
      %cst_33 = arith.constant 0.00999999977 : f32
      %49 = vector.broadcast %cst_33 : f32 to vector<2x64xf32>
      %50 = arith.mulf %49, %48 : vector<2x64xf32>
      %51 = arith.maximumf %48, %50 : vector<2x64xf32>
      %c0_34 = arith.constant 0 : index
      %c0_35 = arith.constant 0 : index
      %52 = vector.load %arg12[%c0_34, %c0_35] : memref<2x64xf32, #tpu.memory_space<vmem>>, vector<2x64xf32>
      tpu.vector_store %arg12[%c0_34, %c0_35], %51 {strides = array<i32>} : memref<2x64xf32, #tpu.memory_space<vmem>>, vector<2x64xf32>,
    } else {
    }
    return
  }
  func.func @transform_0(%arg0: i32, %arg1: i32) -> (i32, i32, i32) {
    %c0_i32 = arith.constant 0 : i32
    %c0_i32_0 = arith.constant 0 : i32
    %c0_i32_1 = arith.constant 0 : i32
    return %arg0, %c0_i32, %c0_i32_0 : i32, i32, i32
  }
  func.func @transform_1(%arg0: i32, %arg1: i32) -> (i32, i32) {
    %c0_i32 = arith.constant 0 : i32
    %c0_i32_0 = arith.constant 0 : i32
    %c0_i32_1 = arith.constant 0 : i32
    return %c0_i32, %c0_i32_0 : i32, i32
  }
  func.func @transform_2(%arg0: i32, %arg1: i32) -> (i32, i32) {
    %c0_i32 = arith.constant 0 : i32
    %c0_i32_0 = arith.constant 0 : i32
    %c0_i32_1 = arith.constant 0 : i32
    return %c0_i32, %c0_i32_0 : i32, i32
  }
  func.func @transform_3(%arg0: i32, %arg1: i32) -> (i32, i32) {
    %c0_i32 = arith.constant 0 : i32
    %c0_i32_0 = arith.constant 0 : i32
    %c0_i32_1 = arith.constant 0 : i32
    return %c0_i32, %c0_i32_0 : i32, i32
  }
  func.func @transform_4(%arg0: i32, %arg1: i32) -> (i32, i32) {
    %c0_i32 = arith.constant 0 : i32
    %c0_i32_0 = arith.constant 0 : i32
    %c0_i32_1 = arith.constant 0 : i32
    return %c0_i32, %c0_i32_0 : i32, i32
  }
  func.func @transform_5(%arg0: i32, %arg1: i32) -> (i32, i32) {
    %c0_i32 = arith.constant 0 : i32
    %c0_i32_0 = arith.constant 0 : i32
    %c0_i32_1 = arith.constant 0 : i32
    return %c0_i32, %c0_i32_0 : i32, i32
  }
  func.func @transform_6(%arg0: i32, %arg1: i32) -> (i32, i32) {
    %c0_i32 = arith.constant 0 : i32
    %c0_i32_0 = arith.constant 0 : i32
    %c0_i32_1 = arith.constant 0 : i32
    return %c0_i32, %c0_i32_0 : i32, i32
  }
  func.func @transform_7(%arg0: i32, %arg1: i32) -> (i32, i32) {
    %c0_i32 = arith.constant 0 : i32
    %c0_i32_0 = arith.constant 0 : i32
    %c0_i32_1 = arith.constant 0 : i32
    return %c0_i32, %c0_i32_0 : i32, i32
  }
  func.func @transform_8(%arg0: i32, %arg1: i32) -> (i32, i32) {
    %c0_i32 = arith.constant 0 : i32
    %c0_i32_0 = arith.constant 0 : i32
    %c0_i32_1 = arith.constant 0 : i32
    return %c0_i32, %c0_i32_0 : i32, i32
  }
  func.func @transform_9(%arg0: i32, %arg1: i32) -> (i32, i32) {
    %c0_i32 = arith.constant 0 : i32
    %c0_i32_0 = arith.constant 0 : i32
    %c0_i32_1 = arith.constant 0 : i32
    return %c0_i32, %c0_i32_0 : i32, i32
  }
  func.func @transform_10(%arg0: i32, %arg1: i32) -> (i32, i32) {
    %c0_i32 = arith.constant 0 : i32
    %c0_i32_0 = arith.constant 0 : i32
    return %arg0, %c0_i32 : i32, i32
  }
}

</mosaic_0001>

<bundles_post_ra>
// kernel: batch_relational_forward.1
= control target key start
LH: loop header
LB: loop body
LE: loop exit
PB: predicated region body
PF: predicated region fallthrough
CT: control target
= control target key end

     0   :  { %vm63_vm0 = vcmask 1041408   ;;  %vm64_vm1 = vcmask 1042432   ;;  %v1978_v2 = vmov 65535   ;;  %vm56_vm2 = vcmask 39936   ;;  %s2446_s0 = inlined_call_operand.vmem [shape: bf16[2,16,5], index: 0, kind: input, shape index: {}]   ;;  %s2447_s1 = inlined_call_operand.vmem [shape: bf16[5,128], index: 1, kind: input, shape index: {}]   ;;  %s2448_s2 = inlined_call_operand.vmem [shape: f32[1,128], index: 2, kind: input, shape index: {}]   ;;  %s2449_s3 = inlined_call_operand.vmem [shape: bf16[64,64], index: 3, kind: input, shape index: {}]   ;;  %s2450_s4 = inlined_call_operand.vmem [shape: f32[1,64], index: 4, kind: input, shape index: {}]   ;;  %s2451_s5 = inlined_call_operand.vmem [shape: bf16[2,512], index: 5, kind: input, shape index: {}]   ;;  %s2452_s6 = inlined_call_operand.vmem [shape: f32[64,64], index: 6, kind: input, shape index: {}]   ;;  %s2453_s7 = inlined_call_operand.vmem [shape: f32[1,64], index: 7, kind: input, shape index: {}]   ;;  %s2454_s8 = inlined_call_operand.vmem [shape: f32[64,64], index: 8, kind: input, shape index: {}]   ;;  %s2455_s9 = inlined_call_operand.vmem [shape: f32[1,64], index: 9, kind: input, shape index: {}]   ;;  %s2456_s10 = inlined_call_operand.hbm [shape: f32[2,64], index: 10, kind: output, shape index: {}]  }
   0x1   :  { %v45_v0 = vld [vmem:[%s2447_s1] sm:$0x7]  ;;  %v65_v3 = vsel %vm63_vm0, 4294967295, %v1978_v2  ;;  %v1945_v6 = vld [vmem:[%s2446_s0 + $0x8] sm:$0xff]  }
   0x2   :  { %v1944_v1 = vld [vmem:[%s2446_s0] sm:$0xff]   ;;  %v66_v4 = vsel %vm64_vm1, %v65_v3, 0 }
   0x3   :  { %1799 = vmatprep.mubr.msk.bf16.mxu0 %vm56_vm2, %v1944_v1  ;;  %v68_v5 = vand.u32 %v66_v4, %v45_v0 }
   0x5   :  { %1797 = vmatprep.subr.bf16.mxu0 %v68_v5 }
   0x6   :  { %15 = vsyncpa [#allocation6], 0  ;;  %1798 = vmatpush3.bf16.msra.mxu0 %v68_v5  ;;  %v1946_v7 = vld [vmem:[%s2449_s3] sm:$0xff]   ;;  %v1947_v8 = vld [vmem:[%s2449_s3 + $0x8] sm:$0xff]   ;;  %vm130_vm3 = vcmask 523264   ;;  %s1979_s25 = smov 64   ;;  %v175_v22 = vlaneseq }
   0x7   :  { %1803 = vmatprep.subr.bf16.mxu1 %v1946_v7  ;;  %v1653_v9 = vld [vmem:[%s2448_s2] ss:$0 sm:$0xff]  ;;  %v1948_v10 = vld [vmem:[%s2449_s3 + $0x10] sm:$0xff]   ;;  %v1949_v18 = vld [vmem:[%s2449_s3 + $0x18] sm:$0xff]   ;;  %v1980_v20 = vmov 1966171168  }
   0x8   :  { %1804 = vmatpush3.bf16.msra.mxu1 %v1946_v7  ;;  %v173_v21 = vunpack.c.l.s4 %v1980_v20  ;;  %v176_v26 = vshrl.u32 %v175_v22, 7  ;;  %vm155_vm4 = vcmask 517120   ;;  %vm1983_vm5 = vmmov 0  }
   0x9   :  { %1800 = vmatmul.mubr.msk.bf16.vlgmr.msra.gmra.mrb[0].mxu0 %vm56_vm2, %v1945_v6  ;;  %1805 = vmatprep.subr.bf16.mxu1 %v1947_v8 }
   0xa   :  { %v174_v25 = vunpack.c.0.s8 %v173_v21  ;;  %v2075_v33 = vsub.s32 0, %v176_v26 }
   0xc   :  { %1806 = vmatpush3.bf16.msra.mxu1 %v1947_v8  ;;  %v2072_v29 = vsub.s32 %v174_v25, %v176_v26 }
   0xd   :  { %1807 = vmatprep.subr.bf16.mxu1 %v1948_v10 }
  0x10   :  { %1808 = vmatpush3.bf16.msra.mxu1 %v1948_v10 }
  0x11   :  { %1809 = vmatprep.subr.bf16.mxu1 %v1949_v18 }
  0x14   :  { %1810 = vmatpush3.bf16.msra.mxu1 %v1949_v18 }
  0xdc   :  { %v1801_v11 = vpop.f32.mrb[0].mxu0 }
  0xdd   :  { %v128_v12 = vadd.f32 %v1801_v11, %v1653_v9  ;;  %v104_v13 = vpop.f32.mrb[1].mxu0 }
  0xde   :  { %v126_v14 = vadd.f32 %v1653_v9, %v104_v13  ;;  %v1802_v15 = vpop.f32.mrb[2].mxu0 }
  0xdf   :  { %133 = vst.msk [vmem:[#allocation2 + $0x10] sm:$0xff] %vm130_vm3, %v128_v12  ;;  %v129_v16 = vadd.f32 %v1802_v15, %v1653_v9  ;;  %143 = vrot.lane.b32.xlu1 %v128_v12, %s1979_s25  ;;  %v107_v17 = vpop.f32.mrb[3].mxu0 }
  0xe0   :  { %131 = vst.msk [vmem:[#allocation2] sm:$0xff] %vm130_vm3, %v126_v14  ;;  %v127_v19 = vadd.f32 %v1653_v9, %v107_v17  ;;  %139 = vrot.lane.b32.xlu0 %v126_v14, %s1979_s25 }
  0xe1   :  { %134 = vst.msk [vmem:[#allocation2 + $0x18] sm:$0xff] %vm130_vm3, %v129_v16 }
  0xe2   :  { %132 = vst.msk [vmem:[#allocation2 + $0x8] sm:$0xff] %vm130_vm3, %v127_v19 }
  0xe3   :  { %145 = vrot.lane.b32.xlu1 %v129_v16, %s1979_s25 }
  0xe4   :  { %141 = vrot.lane.b32.xlu0 %v127_v19, %s1979_s25 }
  0xe7   :  { %v2082_v41 = vld [vmem:[#allocation2] sm:$0xff] }
  0xe9   :  { %v2084_v42 = vld [vmem:[#allocation2 + $0x8] sm:$0xff] }
 0x151   :  { %v144_v23 = vpop.permute.xlu1 %143 }
 0x152   :  { %153 = vst.msk [vmem:[#allocation3 + $0x10] sm:$0xff] %vm130_vm3, %v144_v23  ;;  %v140_v24 = vpop.permute.xlu0 %139 }
 0x153   :  { %151 = vst.msk [vmem:[#allocation3] sm:$0xff] %vm130_vm3, %v140_v24 }
 0x155   :  { %v146_v27 = vpop.permute.xlu1 %145 }
 0x156   :  { %154 = vst.msk [vmem:[#allocation3 + $0x18] sm:$0xff] %vm130_vm3, %v146_v27  ;;  %v142_v28 = vpop.permute.xlu0 %141 }
 0x157   :  { %152 = vst.msk [vmem:[#allocation3 + $0x8] sm:$0xff] %vm130_vm3, %v142_v28 }
 0x15a   :  { %v163_v30 = vld [vmem:[#allocation3] sm:$0xff] }
 0x15b   :  { %v171_v31 = vcombine.high %v163_v30, %v163_v30  ;;  %v178_v32 = vrot.slane %v163_v30, %v2072_v29 }
 0x15d   :  { %v185_v34 = vrot.slane %v171_v31, %v2072_v29  ;;  %v186_v35 = vcombine.high %v178_v32, %v178_v32  ;;  %v194_v36 = vrot.slane %v178_v32, %v2072_v29 }
 0x15e   :  { %v164_v8 = vld [vmem:[#allocation3 + $0x8] sm:$0xff] }
 0x15f   :  { %v216_v37 = vcombine.high %v194_v36, %v194_v36  ;;  %v370_v38 = vrot.slane %v194_v36, %v2075_v33  ;;  %v208_v39 = vrot.slane %v186_v35, %v2072_v29  ;;  %v201_v40 = vrot.slane %v185_v34, %v2072_v29 }
 0x160   :  { %v187_v43 = vcombine.high %v185_v34, %v185_v34  ;;  %v227_v19 = vrot.slane %v164_v8, %v2072_v29 }
 0x161   :  { %v527_v44 = vadd.f32 %v370_v38, %v2082_v41  ;;  %v528_v45 = vadd.f32 %v370_v38, %v2084_v42  ;;  %v374_v46 = vrot.slane %v208_v39, %v2075_v33  ;;  %v378_v47 = vrot.slane %v216_v37, %v2075_v33 }
 0x162   :  { %v218_v48 = vcombine.high %v208_v39, %v208_v39  ;;  %v386_v49 = vrot.slane %v201_v40, %v2075_v33  ;;  %v215_v50 = vrot.slane %v187_v43, %v2072_v29  ;;  %v217_v51 = vcombine.high %v201_v40, %v201_v40 }
 0x163   :  { %v591_v52 = vmul.f32 0.01, %v527_v44  ;;  %v592_v53 = vmul.f32 0.01, %v528_v45  ;;  %v529_v54 = vadd.f32 %v374_v46, %v2082_v41  ;;  %v530_v55 = vadd.f32 %v374_v46, %v2084_v42 }
 0x164   :  { %v531_v56 = vadd.f32 %v378_v47, %v2082_v41  ;;  %v532_v57 = vadd.f32 %v378_v47, %v2084_v42  ;;  %v382_v58 = vrot.slane %v218_v48, %v2075_v33  ;;  %v535_v59 = vadd.f32 %v386_v49, %v2082_v41 }
 0x165   :  { %v655_v60 = vmax.f32 %v527_v44, %v591_v52  ;;  %v656_v61 = vmax.f32 %v528_v45, %v592_v53  ;;  %v593_v62 = vmul.f32 0.01, %v529_v54  ;;  %v594_v63 = vmul.f32 0.01, %v530_v55 }
 0x166   :  { %v595_v0 = vmul.f32 0.01, %v531_v56  ;;  %v596_v1 = vmul.f32 0.01, %v532_v57  ;;  %v533_v2 = vadd.f32 %v382_v58, %v2082_v41  ;;  %v534_v3 = vadd.f32 %v382_v58, %v2084_v42 }
 0x167   :  { %v719_v4 = vpack.c.bf16 %v656_v61, %v655_v60  ;;  %v657_v5 = vmax.f32 %v529_v54, %v593_v62  ;;  %v658_v6 = vmax.f32 %v530_v55, %v594_v63  ;;  %v536_v7 = vadd.f32 %v386_v49, %v2084_v42 }
 0x168   :  { %v659_v9 = vmax.f32 %v531_v56, %v595_v0  ;;  %v660_v10 = vmax.f32 %v532_v57, %v596_v1  ;;  %v597_v11 = vmul.f32 0.01, %v533_v2  ;;  %v598_v13 = vmul.f32 0.01, %v534_v3 }
 0x169   :  { %1811 = vmatprep.mubr.msk.bf16.mxu1 %vm130_vm3, %v719_v4  ;;  %v720_v12 = vpack.c.bf16 %v658_v6, %v657_v5  ;;  %v599_v14 = vmul.f32 0.01, %v535_v59  ;;  %v390_v15 = vrot.slane %v215_v50, %v2075_v33  ;;  %v600_v17 = vmul.f32 0.01, %v536_v7 }
 0x16a   :  { %v721_v16 = vpack.c.bf16 %v660_v10, %v659_v9  ;;  %v394_v18 = vrot.slane %v217_v51, %v2075_v33  ;;  %v661_v20 = vmax.f32 %v533_v2, %v597_v11  ;;  %v662_v22 = vmax.f32 %v534_v3, %v598_v13 }
 0x16b   :  { %1812 = vmatmul.mubr.msk.bf16.vlgmr.msra.gmra.mrb[0].mxu1 %vm130_vm3, %v720_v12  ;;  %v537_v21 = vadd.f32 %v390_v15, %v2082_v41  ;;  %v663_v23 = vmax.f32 %v535_v59, %v599_v14  ;;  %v538_v24 = vadd.f32 %v390_v15, %v2084_v42  ;;  %v219_v25 = vcombine.high %v215_v50, %v215_v50 }
 0x16c   :  { %1815 = vmatprep.mubr.msk.bf16.mxu1 %vm130_vm3, %v721_v16  ;;  %v664_v26 = vmax.f32 %v536_v7, %v600_v17  ;;  %v539_v27 = vadd.f32 %v394_v18, %v2082_v41  ;;  %v540_v28 = vadd.f32 %v394_v18, %v2084_v42  ;;  %v243_v30 = vrot.slane %v227_v19, %v2072_v29 }
 0x16d   :  { %v601_v31 = vmul.f32 0.01, %v537_v21  ;;  %v722_v32 = vpack.c.bf16 %v662_v22, %v661_v20  ;;  %v602_v34 = vmul.f32 0.01, %v538_v24  ;;  %v398_v35 = vrot.slane %v219_v25, %v2075_v33 }
 0x16e   :  { %v235_v36 = vcombine.high %v227_v19, %v227_v19  ;;  %v723_v37 = vpack.c.bf16 %v664_v26, %v663_v23  ;;  %v603_v38 = vmul.f32 0.01, %v539_v27  ;;  %v604_v39 = vmul.f32 0.01, %v540_v28 }
 0x16f   :  { %v402_v40 = vrot.slane %v243_v30, %v2075_v33  ;;  %v665_v43 = vmax.f32 %v537_v21, %v601_v31  ;;  %v265_v44 = vcombine.high %v243_v30, %v243_v30  ;;  %v220_v45 = vcombine.high %v164_v8, %v164_v8 }
 0x170   :  { %v666_v46 = vmax.f32 %v538_v24, %v602_v34  ;;  %v541_v47 = vadd.f32 %v398_v35, %v2082_v41  ;;  %v542_v48 = vadd.f32 %v398_v35, %v2084_v42  ;;  %v257_v49 = vrot.slane %v235_v36, %v2072_v29  ;;  %v165_v24 = vld [vmem:[#allocation3 + $0x10] sm:$0xff] }
 0x171   :  { %v667_v50 = vmax.f32 %v539_v27, %v603_v38  ;;  %v668_v51 = vmax.f32 %v540_v28, %v604_v39  ;;  %v543_v52 = vadd.f32 %v402_v40, %v2082_v41  ;;  %v544_v53 = vadd.f32 %v402_v40, %v2084_v42 }
 0x172   :  { %v410_v54 = vrot.slane %v265_v44, %v2075_v33  ;;  %v724_v55 = vpack.c.bf16 %v666_v46, %v665_v43  ;;  %v605_v56 = vmul.f32 0.01, %v541_v47  ;;  %v606_v57 = vmul.f32 0.01, %v542_v48 }
 0x173   :  { %1816 = vmatmul.mubr.msk.bf16.gmra.mrb[4].mxu1 %vm130_vm3, %v722_v32  ;;  %v406_v58 = vrot.slane %v257_v49, %v2075_v33  ;;  %v725_v59 = vpack.c.bf16 %v668_v51, %v667_v50  ;;  %v607_v60 = vmul.f32 0.01, %v543_v52  ;;  %v608_v61 = vmul.f32 0.01, %v544_v53 }
 0x174   :  { %1819 = vmatprep.mubr.msk.bf16.mxu1 %vm130_vm3, %v723_v37  ;;  %v234_v62 = vrot.slane %v220_v45, %v2072_v29  ;;  %v547_v63 = vadd.f32 %v410_v54, %v2082_v41  ;;  %v267_v0 = vcombine.high %v257_v49, %v257_v49  ;;  %v669_v1 = vmax.f32 %v541_v47, %v605_v56 }
 0x175   :  { %v670_v2 = vmax.f32 %v542_v48, %v606_v57  ;;  %v545_v3 = vadd.f32 %v406_v58, %v2082_v41  ;;  %v546_v4 = vadd.f32 %v406_v58, %v2084_v42  ;;  %v671_v5 = vmax.f32 %v543_v52, %v607_v60 }
 0x176   :  { %v672_v6 = vmax.f32 %v544_v53, %v608_v61  ;;  %v548_v7 = vadd.f32 %v410_v54, %v2084_v42  ;;  %v250_v8 = vrot.slane %v234_v62, %v2072_v29  ;;  %v611_v9 = vmul.f32 0.01, %v547_v63 }
 0x177   :  { %v414_v10 = vrot.slane %v267_v0, %v2075_v33  ;;  %v726_v11 = vpack.c.bf16 %v670_v2, %v669_v1  ;;  %v609_v12 = vmul.f32 0.01, %v545_v3  ;;  %v610_v13 = vmul.f32 0.01, %v546_v4  ;;  %v2155_v0 = vld [vmem:[#allocation2 + $0x10] sm:$0xff]  ;;  %v2157_v1 = vld [vmem:[#allocation2 + $0x18] sm:$0xff] }
 0x178   :  { %v236_v14 = vcombine.high %v234_v62, %v234_v62  ;;  %v727_v15 = vpack.c.bf16 %v672_v6, %v671_v5  ;;  %v612_v16 = vmul.f32 0.01, %v548_v7  ;;  %v418_v17 = vrot.slane %v250_v8, %v2075_v33 }
 0x179   :  { %v675_v18 = vmax.f32 %v547_v63, %v611_v9  ;;  %v549_v19 = vadd.f32 %v414_v10, %v2082_v41  ;;  %v673_v20 = vmax.f32 %v545_v3, %v609_v12  ;;  %v674_v21 = vmax.f32 %v546_v4, %v610_v13 }
 0x17a   :  { %v550_v22 = vadd.f32 %v414_v10, %v2084_v42  ;;  %v264_v23 = vrot.slane %v236_v14, %v2072_v29  ;;  %v676_v25 = vmax.f32 %v548_v7, %v612_v16  ;;  %v551_v26 = vadd.f32 %v418_v17, %v2082_v41 }
 0x17b   :  { %1820 = vmatmul.mubr.msk.bf16.gmra.mrb[8].mxu1 %vm130_vm3, %v724_v55  ;;  %v552_v27 = vadd.f32 %v418_v17, %v2084_v42  ;;  %v266_v28 = vcombine.high %v250_v8, %v250_v8  ;;  %v613_v30 = vmul.f32 0.01, %v549_v19  ;;  %v276_v31 = vrot.slane %v165_v24, %v2072_v29 }
 0x17c   :  { %1823 = vmatprep.mubr.msk.bf16.mxu1 %vm130_vm3, %v725_v59  ;;  %v728_v32 = vpack.c.bf16 %v674_v21, %v673_v20  ;;  %v614_v34 = vmul.f32 0.01, %v550_v22  ;;  %v422_v35 = vrot.slane %v264_v23, %v2075_v33  ;;  %v729_v36 = vpack.c.bf16 %v676_v25, %v675_v18 }
 0x17d   :  { %v615_v37 = vmul.f32 0.01, %v551_v26  ;;  %v616_v38 = vmul.f32 0.01, %v552_v27  ;;  %v426_v39 = vrot.slane %v266_v28, %v2075_v33  ;;  %v677_v40 = vmax.f32 %v549_v19, %v613_v30 }
 0x17e   :  { %v292_v43 = vrot.slane %v276_v31, %v2072_v29  ;;  %v678_v44 = vmax.f32 %v550_v22, %v614_v34  ;;  %v553_v45 = vadd.f32 %v422_v35, %v2082_v41  ;;  %v554_v46 = vadd.f32 %v422_v35, %v2084_v42 }
 0x17f   :  { %v268_v47 = vcombine.high %v264_v23, %v264_v23  ;;  %v679_v48 = vmax.f32 %v551_v26, %v615_v37  ;;  %v680_v49 = vmax.f32 %v552_v27, %v616_v38  ;;  %v555_v50 = vadd.f32 %v426_v39, %v2082_v41 }
 0x180   :  { %v556_v51 = vadd.f32 %v426_v39, %v2084_v42  ;;  %v284_v52 = vcombine.high %v276_v31, %v276_v31  ;;  %v730_v53 = vpack.c.bf16 %v678_v44, %v677_v40  ;;  %v617_v54 = vmul.f32 0.01, %v553_v45 }
 0x181   :  { %v618_v55 = vmul.f32 0.01, %v554_v46  ;;  %v430_v56 = vrot.slane %v268_v47, %v2075_v33  ;;  %v731_v57 = vpack.c.bf16 %v680_v49, %v679_v48  ;;  %v619_v58 = vmul.f32 0.01, %v555_v50 }
 0x182   :  { %v620_v59 = vmul.f32 0.01, %v556_v51  ;;  %v434_v60 = vrot.slane %v292_v43, %v2075_v33  ;;  %v306_v61 = vrot.slane %v284_v52, %v2072_v29  ;;  %v314_v62 = vcombine.high %v292_v43, %v292_v43 }
 0x183   :  { %1824 = vmatmul.mubr.msk.bf16.gmra.mrb[12].mxu1 %vm130_vm3, %v726_v11  ;;  %v269_v63 = vcombine.high %v165_v24, %v165_v24  ;;  %v681_v2 = vmax.f32 %v553_v45, %v617_v54  ;;  %v682_v3 = vmax.f32 %v554_v46, %v618_v55  ;;  %v557_v4 = vadd.f32 %v430_v56, %v2082_v41 }
 0x184   :  { %1827 = vmatprep.mubr.msk.bf16.mxu1 %vm130_vm3, %v727_v15  ;;  %v558_v5 = vadd.f32 %v430_v56, %v2084_v42  ;;  %v683_v6 = vmax.f32 %v555_v50, %v619_v58  ;;  %v684_v7 = vmax.f32 %v556_v51, %v620_v59  ;;  %v559_v8 = vadd.f32 %v434_v60, %v2155_v0  ;;  %v166_v50 = vld [vmem:[#allocation3 + $0x18] sm:$0xff] }
 0x185   :  { %v560_v9 = vadd.f32 %v434_v60, %v2157_v1  ;;  %v438_v10 = vrot.slane %v306_v61, %v2075_v33  ;;  %v283_v11 = vrot.slane %v269_v63, %v2072_v29  ;;  %v732_v12 = vpack.c.bf16 %v682_v3, %v681_v2 }
 0x186   :  { %v621_v13 = vmul.f32 0.01, %v557_v4  ;;  %v622_v14 = vmul.f32 0.01, %v558_v5  ;;  %v733_v15 = vpack.c.bf16 %v684_v7, %v683_v6  ;;  %v623_v16 = vmul.f32 0.01, %v559_v8 }
 0x187   :  { %v624_v17 = vmul.f32 0.01, %v560_v9  ;;  %v442_v41 = vrot.slane %v314_v62, %v2075_v33  ;;  %v561_v42 = vadd.f32 %v438_v10, %v2155_v0  ;;  %v299_v18 = vrot.slane %v283_v11, %v2072_v29 }
 0x188   :  { %v685_v19 = vmax.f32 %v557_v4, %v621_v13  ;;  %v686_v20 = vmax.f32 %v558_v5, %v622_v14  ;;  %v562_v21 = vadd.f32 %v438_v10, %v2157_v1  ;;  %v316_v22 = vcombine.high %v306_v61, %v306_v61 }
 0x189   :  { %v687_v23 = vmax.f32 %v559_v8, %v623_v16  ;;  %v688_v24 = vmax.f32 %v560_v9, %v624_v17  ;;  %v563_v25 = vadd.f32 %v442_v41, %v2155_v0  ;;  %v564_v26 = vadd.f32 %v442_v41, %v2157_v1 }
 0x18a   :  { %v625_v27 = vmul.f32 0.01, %v561_v42  ;;  %v285_v28 = vcombine.high %v283_v11, %v283_v11  ;;  %v734_v30 = vpack.c.bf16 %v686_v20, %v685_v19  ;;  %v626_v31 = vmul.f32 0.01, %v562_v21 }
 0x18b   :  { %1828 = vmatmul.mubr.msk.bf16.gmra.mrb[16].mxu1 %vm130_vm3, %v728_v32  ;;  %v446_v32 = vrot.slane %v316_v22, %v2075_v33  ;;  %v735_v34 = vpack.c.bf16 %v688_v24, %v687_v23  ;;  %v627_v35 = vmul.f32 0.01, %v563_v25  ;;  %v450_v37 = vrot.slane %v299_v18, %v2075_v33 }
 0x18c   :  { %1831 = vmatprep.mubr.msk.bf16.mxu1 %vm130_vm3, %v729_v36  ;;  %v628_v36 = vmul.f32 0.01, %v564_v26  ;;  %v689_v38 = vmax.f32 %v561_v42, %v625_v27  ;;  %v313_v39 = vrot.slane %v285_v28, %v2072_v29  ;;  %v690_v40 = vmax.f32 %v562_v21, %v626_v31 }
 0x18d   :  { %v565_v43 = vadd.f32 %v446_v32, %v2155_v0  ;;  %v566_v44 = vadd.f32 %v446_v32, %v2157_v1  ;;  %v315_v45 = vcombine.high %v299_v18, %v299_v18  ;;  %v691_v46 = vmax.f32 %v563_v25, %v627_v35 }
 0x18e   :  { %v692_v47 = vmax.f32 %v564_v26, %v628_v36  ;;  %v567_v48 = vadd.f32 %v450_v37, %v2155_v0  ;;  %v568_v49 = vadd.f32 %v450_v37, %v2157_v1  ;;  %v454_v51 = vrot.slane %v313_v39, %v2075_v33 }
 0x18f   :  { %v736_v52 = vpack.c.bf16 %v690_v40, %v689_v38  ;;  %v630_v54 = vmul.f32 0.01, %v566_v44  ;;  %v458_v55 = vrot.slane %v315_v45, %v2075_v33  ;;  %v325_v59 = vrot.slane %v166_v50, %v2072_v29 }
 0x190   :  { %v737_v56 = vpack.c.bf16 %v692_v47, %v691_v46  ;;  %v632_v58 = vmul.f32 0.01, %v568_v49  ;;  %v569_v60 = vadd.f32 %v454_v51, %v2155_v0  ;;  %v317_v61 = vcombine.high %v313_v39, %v313_v39 }
 0x191   :  { %v694_v63 = vmax.f32 %v566_v44, %v630_v54  ;;  %v570_v2 = vadd.f32 %v454_v51, %v2157_v1  ;;  %v571_v3 = vadd.f32 %v458_v55, %v2155_v0  ;;  %v572_v6 = vadd.f32 %v458_v55, %v2157_v1 }
 0x192   :  { %v696_v5 = vmax.f32 %v568_v49, %v632_v58  ;;  %v341_v7 = vrot.slane %v325_v59, %v2072_v29  ;;  %v633_v8 = vmul.f32 0.01, %v569_v60  ;;  %v462_v9 = vrot.slane %v317_v61, %v2075_v33 }
 0x193   :  { %1832 = vmatmul.mubr.msk.bf16.gmra.mrb[20].mxu1 %vm130_vm3, %v730_v53  ;;  %v629_v53 = vmul.f32 0.01, %v565_v43  ;;  %v634_v11 = vmul.f32 0.01, %v570_v2  ;;  %v333_v13 = vcombine.high %v325_v59, %v325_v59  ;;  %v318_v25 = vcombine.high %v166_v50, %v166_v50 }
 0x194   :  { %1835 = vmatprep.mubr.msk.bf16.mxu1 %vm130_vm3, %v731_v57  ;;  %v631_v57 = vmul.f32 0.01, %v567_v48  ;;  %v466_v16 = vrot.slane %v341_v7, %v2075_v33  ;;  %v697_v17 = vmax.f32 %v569_v60, %v633_v8  ;;  %v573_v41 = vadd.f32 %v462_v9, %v2155_v0 }
 0x195   :  { %v693_v62 = vmax.f32 %v565_v43, %v629_v53  ;;  %v574_v42 = vadd.f32 %v462_v9, %v2157_v1  ;;  %v698_v18 = vmax.f32 %v570_v2, %v634_v11  ;;  %v355_v20 = vrot.slane %v333_v13, %v2072_v29 }
 0x196   :  { %v695_v4 = vmax.f32 %v567_v48, %v631_v57  ;;  %v363_v21 = vcombine.high %v341_v7, %v341_v7  ;;  %v575_v23 = vadd.f32 %v466_v16, %v2155_v0  ;;  %v576_v24 = vadd.f32 %v466_v16, %v2157_v1 }
 0x197   :  { %v738_v10 = vpack.c.bf16 %v694_v63, %v693_v62  ;;  %v637_v26 = vmul.f32 0.01, %v573_v41  ;;  %v638_v27 = vmul.f32 0.01, %v574_v42  ;;  %v740_v28 = vpack.c.bf16 %v698_v18, %v697_v17 }
 0x198   :  { %v739_v14 = vpack.c.bf16 %v696_v5, %v695_v4  ;;  %v474_v31 = vrot.slane %v363_v21, %v2075_v33  ;;  %v640_v35 = vmul.f32 0.01, %v576_v24  ;;  %v332_v36 = vrot.slane %v318_v25, %v2072_v29 }
 0x199   :  { %v701_v37 = vmax.f32 %v573_v41, %v637_v26  ;;  %v702_v38 = vmax.f32 %v574_v42, %v638_v27  ;;  %v365_v39 = vcombine.high %v355_v20, %v355_v20 }
 0x19a   :  { %v579_v44 = vadd.f32 %v474_v31, %v2155_v0  ;;  %v704_v46 = vmax.f32 %v576_v24, %v640_v35  ;;  %v580_v47 = vadd.f32 %v474_v31, %v2157_v1  ;;  %v348_v48 = vrot.slane %v332_v36, %v2072_v29 }
 0x19b   :  { %1836 = vmatmul.mubr.msk.bf16.gmra.mrb[24].mxu1 %vm130_vm3, %v732_v12  ;;  %v635_v12 = vmul.f32 0.01, %v571_v3  ;;  %v742_v49 = vpack.c.bf16 %v702_v38, %v701_v37  ;;  %v478_v50 = vrot.slane %v365_v39, %v2075_v33  ;;  %v334_v54 = vcombine.high %v332_v36, %v332_v36 }
 0x19c   :  { %1839 = vmatprep.mubr.msk.bf16.mxu1 %vm130_vm3, %v733_v15  ;;  %v636_v15 = vmul.f32 0.01, %v572_v6  ;;  %v643_v53 = vmul.f32 0.01, %v579_v44  ;;  %v482_v57 = vrot.slane %v348_v48, %v2075_v33  ;;  %v364_v5 = vcombine.high %v348_v48, %v348_v48 }
 0x19d   :  { %v699_v19 = vmax.f32 %v571_v3, %v635_v12  ;;  %v581_v58 = vadd.f32 %v478_v50, %v2155_v0  ;;  %v582_v59 = vadd.f32 %v478_v50, %v2157_v1  ;;  %v362_v63 = vrot.slane %v334_v54, %v2072_v29 }
 0x19e   :  { %v700_v22 = vmax.f32 %v572_v6, %v636_v15  ;;  %v707_v62 = vmax.f32 %v579_v44, %v643_v53  ;;  %v583_v3 = vadd.f32 %v482_v57, %v2155_v0  ;;  %v584_v4 = vadd.f32 %v482_v57, %v2157_v1 }
 0x19f   :  { %v645_v6 = vmul.f32 0.01, %v581_v58  ;;  %v646_v8 = vmul.f32 0.01, %v582_v59  ;;  %v486_v9 = vrot.slane %v362_v63, %v2075_v33  ;;  %v490_v13 = vrot.slane %v364_v5, %v2075_v33 }
 0x1a0   :  { %v741_v32 = vpack.c.bf16 %v700_v22, %v699_v19  ;;  %v647_v11 = vmul.f32 0.01, %v583_v3  ;;  %v648_v12 = vmul.f32 0.01, %v584_v4  ;;  %v366_v41 = vcombine.high %v362_v63, %v362_v63 }
 0x1a1   :  { %v710_v15 = vmax.f32 %v582_v59, %v646_v8  ;;  %v585_v16 = vadd.f32 %v486_v9, %v2155_v0  ;;  %v586_v17 = vadd.f32 %v486_v9, %v2157_v1  ;;  %v587_v19 = vadd.f32 %v490_v13, %v2155_v0 }
 0x1a2   :  { %v711_v42 = vmax.f32 %v583_v3, %v647_v11  ;;  %v712_v18 = vmax.f32 %v584_v4, %v648_v12  ;;  %v494_v24 = vrot.slane %v366_v41, %v2075_v33 }
 0x1a3   :  { %1840 = vmatmul.mubr.msk.bf16.gmra.mrb[28].mxu1 %vm130_vm3, %v734_v30  ;;  %v470_v30 = vrot.slane %v355_v20, %v2075_v33  ;;  %v588_v20 = vadd.f32 %v490_v13, %v2157_v1  ;;  %v649_v22 = vmul.f32 0.01, %v585_v16  ;;  %v651_v26 = vmul.f32 0.01, %v587_v19 }
 0x1a4   :  { %1843 = vmatprep.mubr.msk.bf16.mxu1 %vm130_vm3, %v735_v34  ;;  %v639_v34 = vmul.f32 0.01, %v575_v23  ;;  %v747_v25 = vpack.c.bf16 %v712_v18, %v711_v42  ;;  %v589_v31 = vadd.f32 %v494_v24, %v2155_v0 }
 0x1a5   :  { %v577_v40 = vadd.f32 %v470_v30, %v2155_v0  ;;  %v578_v43 = vadd.f32 %v470_v30, %v2157_v1  ;;  %v652_v27 = vmul.f32 0.01, %v588_v20  ;;  %v2239_v0 = vld.sshfl [vmem:[%s2451_s5] sm:$0x33 pattern:$0x75316420] }
 0x1a6   :  { %v703_v45 = vmax.f32 %v575_v23, %v639_v34  ;;  %v650_v23 = vmul.f32 0.01, %v586_v17  ;;  %v715_v34 = vmax.f32 %v587_v19, %v651_v26  ;;  %v653_v37 = vmul.f32 0.01, %v589_v31 }
 0x1a7   :  { %v641_v51 = vmul.f32 0.01, %v577_v40  ;;  %v716_v35 = vmax.f32 %v588_v20, %v652_v27 }
 0x1a8   :  { %v743_v55 = vpack.c.bf16 %v704_v46, %v703_v45  ;;  %v714_v30 = vmax.f32 %v586_v17, %v650_v23  ;;  %v717_v33 = vmax.f32 %v589_v31, %v653_v37  ;;  %v2250_v45 = vld [vmem:[%s2450_s4] ss:$0 sm:$0xff] }
 0x1a9   :  { %v705_v60 = vmax.f32 %v577_v40, %v641_v51  ;;  %v749_v39 = vpack.c.bf16 %v716_v35, %v715_v34 }
 0x1ab   :  { %1844 = vmatmul.mubr.msk.bf16.gmra.mrb[32].mxu1 %vm130_vm3, %v736_v52  ;;  %v642_v52 = vmul.f32 0.01, %v578_v43 }
 0x1ac   :  { %1847 = vmatprep.mubr.msk.bf16.mxu1 %vm130_vm3, %v737_v56  ;;  %v644_v56 = vmul.f32 0.01, %v580_v47 }
 0x1ad   :  { %v706_v61 = vmax.f32 %v578_v43, %v642_v52 }
 0x1ae   :  { %v708_v2 = vmax.f32 %v580_v47, %v644_v56 }
 0x1af   :  { %v744_v7 = vpack.c.bf16 %v706_v61, %v705_v60 }
 0x1b3   :  { %1848 = vmatmul.mubr.msk.bf16.gmra.mrb[36].mxu1 %vm130_vm3, %v738_v10  ;;  %v745_v10 = vpack.c.bf16 %v708_v2, %v707_v62 }
 0x1b4   :  { %1851 = vmatprep.mubr.msk.bf16.mxu1 %vm130_vm3, %v739_v14  ;;  %v709_v14 = vmax.f32 %v581_v58, %v645_v6 }
 0x1b6   :  { %v746_v21 = vpack.c.bf16 %v710_v15, %v709_v14 }
 0x1bb   :  { %1852 = vmatmul.mubr.msk.bf16.gmra.mrb[40].mxu1 %vm130_vm3, %v740_v28  ;;  %v713_v28 = vmax.f32 %v585_v16, %v649_v22 }
 0x1bc   :  { %1855 = vmatprep.mubr.msk.bf16.mxu1 %vm130_vm3, %v741_v32  ;;  %v590_v32 = vadd.f32 %v494_v24, %v2157_v1  ;;  %v1346_v1 = vcombine.high %v2239_v0, %v2239_v0 }
 0x1bd   :  { %v748_v36 = vpack.c.bf16 %v714_v30, %v713_v28 }
 0x1be   :  { %v654_v38 = vmul.f32 0.01, %v590_v32  ;;  %v2244_v44 = vrot.slane %v1346_v1, %v2072_v29 }
 0x1c0   :  { %v718_v40 = vmax.f32 %v590_v32, %v654_v38  ;;  %1399 = vmatprep.mubr.bf16.mxu0 %v2244_v44 }
 0x1c2   :  { %v750_v43 = vpack.c.bf16 %v718_v40, %v717_v33 }
 0x1c3   :  { %1856 = vmatmul.mubr.msk.bf16.gmra.mrb[44].mxu1 %vm130_vm3, %v742_v49 }
 0x1c4   :  { %1859 = vmatprep.mubr.msk.bf16.mxu1 %vm130_vm3, %v743_v55 }
 0x1cb   :  { %1860 = vmatmul.mubr.msk.bf16.gmra.mrb[48].mxu1 %vm130_vm3, %v744_v7 }
 0x1cc   :  { %1863 = vmatprep.mubr.msk.bf16.mxu1 %vm130_vm3, %v745_v10 }
 0x1d3   :  { %1864 = vmatmul.mubr.msk.bf16.gmra.mrb[52].mxu1 %vm130_vm3, %v746_v21 }
 0x1d4   :  { %1867 = vmatprep.mubr.msk.bf16.mxu1 %vm130_vm3, %v747_v25 }
 0x1db   :  { %1868 = vmatmul.mubr.msk.bf16.gmra.mrb[56].mxu1 %vm130_vm3, %v748_v36 }
 0x1dc   :  { %1871 = vmatprep.mubr.msk.bf16.mxu1 %vm130_vm3, %v749_v39 }
 0x1e3   :  { %1872 = vmatmul.mubr.msk.bf16.gmra.mrb[60].mxu1 %vm130_vm3, %v750_v43 }
 0x23e   :  { %v1813_v46 = vpop.f32.mrb[0].mxu1 }
 0x23f   :  { %v930_v47 = vadd.f32 %v1813_v46, %v2250_v45  ;;  %v921_v48 = vpop.f32.mrb[1].mxu1 }
 0x240   :  { %v922_v49 = vadd.f32 %v2250_v45, %v921_v48  ;;  %v1814_v50 = vpop.f32.mrb[2].mxu1 }
 0x241   :  { %v1178_v51 = vmul.f32 0.01, %v930_v47  ;;  %v933_v52 = vadd.f32 %v1814_v50, %v2250_v45  ;;  %v924_v53 = vpop.f32.mrb[3].mxu1 }
 0x242   :  { %v1176_v54 = vmul.f32 0.01, %v922_v49  ;;  %v925_v55 = vadd.f32 %v2250_v45, %v924_v53 }
 0x243   :  { %v1179_v56 = vmul.f32 0.01, %v933_v52  ;;  %v1242_v58 = vmax.f32 %v930_v47, %v1178_v51 }
 0x244   :  { %v1177_v57 = vmul.f32 0.01, %v925_v55  ;;  %v1240_v60 = vmax.f32 %v922_v49, %v1176_v54 }
 0x245   :  { %v1243_v59 = vmax.f32 %v933_v52, %v1179_v56 }
 0x246   :  { %v1241_v61 = vmax.f32 %v925_v55, %v1177_v57  ;;  %v1817_v62 = vpop.f32.mrb[4].mxu1 }
 0x247   :  { %v2256_v63 = vpack.c.bf16 %v1243_v59, %v1242_v58  ;;  %v946_v2 = vadd.f32 %v1817_v62, %v2250_v45  ;;  %v937_v3 = vpop.f32.mrb[5].mxu1 }
 0x248   :  { %v2259_v4 = vpack.c.bf16 %v1241_v61, %v1240_v60  ;;  %v938_v5 = vadd.f32 %v2250_v45, %v937_v3  ;;  %v1818_v6 = vpop.f32.mrb[6].mxu1 }
 0x249   :  { %v1182_v7 = vmul.f32 0.01, %v946_v2  ;;  %v949_v8 = vadd.f32 %v1818_v6, %v2250_v45  ;;  %v940_v9 = vpop.f32.mrb[7].mxu1 }
 0x24a   :  { %v1180_v10 = vmul.f32 0.01, %v938_v5  ;;  %v941_v11 = vadd.f32 %v2250_v45, %v940_v9 }
 0x24b   :  { %v1183_v12 = vmul.f32 0.01, %v949_v8  ;;  %v1246_v14 = vmax.f32 %v946_v2, %v1182_v7 }
 0x24c   :  { %v1181_v13 = vmul.f32 0.01, %v941_v11  ;;  %v1244_v16 = vmax.f32 %v938_v5, %v1180_v10 }
 0x24d   :  { %v1247_v15 = vmax.f32 %v949_v8, %v1183_v12 }
 0x24e   :  { %v1245_v17 = vmax.f32 %v941_v11, %v1181_v13  ;;  %v1821_v41 = vpop.f32.mrb[8].mxu1 }
 0x24f   :  { %v2264_v42 = vpack.c.bf16 %v1247_v15, %v1246_v14  ;;  %v962_v18 = vadd.f32 %v1821_v41, %v2250_v45  ;;  %v953_v19 = vpop.f32.mrb[9].mxu1 }
 0x250   :  { %v2267_v20 = vpack.c.bf16 %v1245_v17, %v1244_v16  ;;  %v954_v21 = vadd.f32 %v2250_v45, %v953_v19  ;;  %v1822_v22 = vpop.f32.mrb[10].mxu1 }
 0x251   :  { %v1186_v23 = vmul.f32 0.01, %v962_v18  ;;  %v965_v24 = vadd.f32 %v1822_v22, %v2250_v45  ;;  %v956_v25 = vpop.f32.mrb[11].mxu1 }
 0x252   :  { %v1184_v26 = vmul.f32 0.01, %v954_v21  ;;  %v957_v27 = vadd.f32 %v2250_v45, %v956_v25 }
 0x253   :  { %v1187_v28 = vmul.f32 0.01, %v965_v24  ;;  %v1250_v31 = vmax.f32 %v962_v18, %v1186_v23 }
 0x254   :  { %v1185_v30 = vmul.f32 0.01, %v957_v27  ;;  %v1248_v34 = vmax.f32 %v954_v21, %v1184_v26 }
 0x255   :  { %v1251_v32 = vmax.f32 %v965_v24, %v1187_v28 }
 0x256   :  { %v1249_v35 = vmax.f32 %v957_v27, %v1185_v30  ;;  %v1825_v36 = vpop.f32.mrb[12].mxu1 }
 0x257   :  { %v2272_v37 = vpack.c.bf16 %v1251_v32, %v1250_v31  ;;  %v978_v38 = vadd.f32 %v1825_v36, %v2250_v45  ;;  %v969_v39 = vpop.f32.mrb[13].mxu1 }
 0x258   :  { %v2275_v33 = vpack.c.bf16 %v1249_v35, %v1248_v34  ;;  %v970_v40 = vadd.f32 %v2250_v45, %v969_v39  ;;  %v1826_v43 = vpop.f32.mrb[14].mxu1 }
 0x259   :  { %v1190_v1 = vmul.f32 0.01, %v978_v38  ;;  %v981_v46 = vadd.f32 %v1826_v43, %v2250_v45  ;;  %v972_v47 = vpop.f32.mrb[15].mxu1 }
 0x25a   :  { %v1188_v48 = vmul.f32 0.01, %v970_v40  ;;  %v973_v49 = vadd.f32 %v2250_v45, %v972_v47 }
 0x25b   :  { %v1191_v50 = vmul.f32 0.01, %v981_v46  ;;  %v1254_v52 = vmax.f32 %v978_v38, %v1190_v1 }
 0x25c   :  { %v1189_v51 = vmul.f32 0.01, %v973_v49  ;;  %v1252_v54 = vmax.f32 %v970_v40, %v1188_v48 }
 0x25d   :  { %v1255_v53 = vmax.f32 %v981_v46, %v1191_v50 }
 0x25e   :  { %v1253_v55 = vmax.f32 %v973_v49, %v1189_v51  ;;  %v1829_v56 = vpop.f32.mrb[16].mxu1 }
 0x25f   :  { %v2280_v57 = vpack.c.bf16 %v1255_v53, %v1254_v52  ;;  %v994_v58 = vadd.f32 %v1829_v56, %v2250_v45  ;;  %v985_v59 = vpop.f32.mrb[17].mxu1 }
 0x260   :  { %v2283_v60 = vpack.c.bf16 %v1253_v55, %v1252_v54  ;;  %v986_v61 = vadd.f32 %v2250_v45, %v985_v59  ;;  %v1830_v62 = vpop.f32.mrb[18].mxu1 }
 0x261   :  { %v1194_v2 = vmul.f32 0.01, %v994_v58  ;;  %v997_v3 = vadd.f32 %v1830_v62, %v2250_v45  ;;  %v988_v5 = vpop.f32.mrb[19].mxu1 }
 0x262   :  { %v1192_v6 = vmul.f32 0.01, %v986_v61  ;;  %v989_v7 = vadd.f32 %v2250_v45, %v988_v5 }
 0x263   :  { %v1195_v8 = vmul.f32 0.01, %v997_v3  ;;  %v1258_v10 = vmax.f32 %v994_v58, %v1194_v2 }
 0x264   :  { %v1193_v9 = vmul.f32 0.01, %v989_v7  ;;  %v1256_v12 = vmax.f32 %v986_v61, %v1192_v6 }
 0x265   :  { %v1259_v11 = vmax.f32 %v997_v3, %v1195_v8 }
 0x266   :  { %v1257_v13 = vmax.f32 %v989_v7, %v1193_v9  ;;  %v1833_v14 = vpop.f32.mrb[20].mxu1 }
 0x267   :  { %v1010_v15 = vadd.f32 %v1833_v14, %v2250_v45  ;;  %v1001_v16 = vpop.f32.mrb[21].mxu1  ;;  %v1315_v17 = vpack.c.bf16 %v1259_v11, %v1258_v10 }
 0x268   :  { %v1002_v41 = vadd.f32 %v2250_v45, %v1001_v16  ;;  %v1834_v18 = vpop.f32.mrb[22].mxu1  ;;  %v1314_v19 = vpack.c.bf16 %v1257_v13, %v1256_v12 }
 0x269   :  { %v1198_v21 = vmul.f32 0.01, %v1010_v15  ;;  %v1013_v22 = vadd.f32 %v1834_v18, %v2250_v45  ;;  %v1004_v23 = vpop.f32.mrb[23].mxu1 }
 0x26a   :  { %v1196_v24 = vmul.f32 0.01, %v1002_v41  ;;  %v1005_v25 = vadd.f32 %v2250_v45, %v1004_v23  ;;  %1735 = vmatprep.subr.bf16.mxu0 %v1314_v19 }
 0x26b   :  { %v1199_v26 = vmul.f32 0.01, %v1013_v22  ;;  %1736 = vmatpush3.bf16.msra.mxu0 %v2259_v4  ;;  %v1262_v28 = vmax.f32 %v1010_v15, %v1198_v21 }
 0x26c   :  { %v1197_v27 = vmul.f32 0.01, %v1005_v25  ;;  %1737 = vmatprep.subr.bf16.mxu0 %v1315_v17  ;;  %v1260_v31 = vmax.f32 %v1002_v41, %v1196_v24 }
 0x26d   :  { %v1263_v30 = vmax.f32 %v1013_v22, %v1199_v26 }
 0x26e   :  { %v1261_v32 = vmax.f32 %v1005_v25, %v1197_v27  ;;  %v1837_v34 = vpop.f32.mrb[24].mxu1 }
 0x26f   :  { %v1026_v35 = vadd.f32 %v1837_v34, %v2250_v45  ;;  %v1017_v36 = vpop.f32.mrb[25].mxu1  ;;  %1738 = vmatpush3.bf16.msra.mxu0 %v2256_v63  ;;  %v1317_v38 = vpack.c.bf16 %v1263_v30, %v1262_v28  ;;  %v2313_v30 = vrot.slane %v2239_v0, %v2072_v29 }
 0x270   :  { %v1018_v39 = vadd.f32 %v2250_v45, %v1017_v36  ;;  %v1838_v40 = vpop.f32.mrb[26].mxu1  ;;  %v1316_v43 = vpack.c.bf16 %v1261_v32, %v1260_v31 }
 0x271   :  { %v1202_v1 = vmul.f32 0.01, %v1026_v35  ;;  %v1029_v4 = vadd.f32 %v1838_v40, %v2250_v45  ;;  %v1020_v46 = vpop.f32.mrb[27].mxu1 }
 0x272   :  { %v1200_v47 = vmul.f32 0.01, %v1018_v39  ;;  %v1021_v48 = vadd.f32 %v2250_v45, %v1020_v46  ;;  %1739 = vmatprep.subr.bf16.mxu0 %v1316_v43 }
 0x273   :  { %v1203_v49 = vmul.f32 0.01, %v1029_v4  ;;  %1740 = vmatpush3.bf16.msra.mxu0 %v2267_v20  ;;  %v1266_v51 = vmax.f32 %v1026_v35, %v1202_v1 }
 0x274   :  { %v1201_v50 = vmul.f32 0.01, %v1021_v48  ;;  %1741 = vmatprep.subr.bf16.mxu0 %v1317_v38  ;;  %v1264_v52 = vmax.f32 %v1018_v39, %v1200_v47 }
 0x275   :  { %v1267_v63 = vmax.f32 %v1029_v4, %v1203_v49 }
 0x276   :  { %v1265_v53 = vmax.f32 %v1021_v48, %v1201_v50  ;;  %v1841_v54 = vpop.f32.mrb[28].mxu1 }
 0x277   :  { %v1042_v55 = vadd.f32 %v1841_v54, %v2250_v45  ;;  %v1033_v56 = vpop.f32.mrb[29].mxu1  ;;  %1742 = vmatpush3.bf16.msra.mxu0 %v2264_v42  ;;  %v1319_v58 = vpack.c.bf16 %v1267_v63, %v1266_v51 }
 0x278   :  { %v1034_v59 = vadd.f32 %v2250_v45, %v1033_v56  ;;  %v1842_v61 = vpop.f32.mrb[30].mxu1  ;;  %v1318_v62 = vpack.c.bf16 %v1265_v53, %v1264_v52 }
 0x279   :  { %v1206_v2 = vmul.f32 0.01, %v1042_v55  ;;  %v1045_v20 = vadd.f32 %v1842_v61, %v2250_v45  ;;  %v1036_v3 = vpop.f32.mrb[31].mxu1 }
 0x27a   :  { %v1204_v5 = vmul.f32 0.01, %v1034_v59  ;;  %v1037_v6 = vadd.f32 %v2250_v45, %v1036_v3  ;;  %1743 = vmatprep.subr.bf16.mxu0 %v1318_v62 }
 0x27b   :  { %v1207_v7 = vmul.f32 0.01, %v1045_v20  ;;  %1744 = vmatpush3.bf16.msra.mxu0 %v2275_v33  ;;  %v1270_v9 = vmax.f32 %v1042_v55, %v1206_v2 }
 0x27c   :  { %v1205_v8 = vmul.f32 0.01, %v1037_v6  ;;  %1745 = vmatprep.subr.bf16.mxu0 %v1319_v58  ;;  %v1268_v10 = vmax.f32 %v1034_v59, %v1204_v5 }
 0x27d   :  { %v1271_v42 = vmax.f32 %v1045_v20, %v1207_v7 }
 0x27e   :  { %v1269_v11 = vmax.f32 %v1037_v6, %v1205_v8  ;;  %v1845_v12 = vpop.f32.mrb[32].mxu1 }
 0x27f   :  { %v1058_v13 = vadd.f32 %v1845_v12, %v2250_v45  ;;  %v1049_v14 = vpop.f32.mrb[33].mxu1  ;;  %1746 = vmatpush3.bf16.msra.mxu0 %v2272_v37  ;;  %v1321_v15 = vpack.c.bf16 %v1271_v42, %v1270_v9 }
 0x280   :  { %v1050_v16 = vadd.f32 %v2250_v45, %v1049_v14  ;;  %v1846_v17 = vpop.f32.mrb[34].mxu1  ;;  %v1320_v41 = vpack.c.bf16 %v1269_v11, %v1268_v10 }
 0x281   :  { %v1210_v18 = vmul.f32 0.01, %v1058_v13  ;;  %v1061_v33 = vadd.f32 %v1846_v17, %v2250_v45  ;;  %v1052_v19 = vpop.f32.mrb[35].mxu1 }
 0x282   :  { %v1208_v21 = vmul.f32 0.01, %v1050_v16  ;;  %v1053_v22 = vadd.f32 %v2250_v45, %v1052_v19  ;;  %1747 = vmatprep.subr.bf16.mxu0 %v1320_v41 }
 0x283   :  { %v1211_v23 = vmul.f32 0.01, %v1061_v33  ;;  %1748 = vmatpush3.bf16.msra.mxu0 %v2283_v60  ;;  %v1274_v25 = vmax.f32 %v1058_v13, %v1210_v18  ;;  %v1362_v60 = vcombine.high %v2244_v44, %v2244_v44 }
 0x284   :  { %v1209_v24 = vmul.f32 0.01, %v1053_v22  ;;  %1749 = vmatprep.subr.bf16.mxu0 %v1321_v15  ;;  %v1272_v26 = vmax.f32 %v1050_v16, %v1208_v21 }
 0x285   :  { %v1275_v37 = vmax.f32 %v1061_v33, %v1211_v23 }
 0x286   :  { %v1273_v27 = vmax.f32 %v1053_v22, %v1209_v24  ;;  %v1849_v28 = vpop.f32.mrb[36].mxu1 }
 0x287   :  { %v2315_v31 = vpack.c.bf16 %v1275_v37, %v1274_v25  ;;  %v1074_v32 = vadd.f32 %v1849_v28, %v2250_v45  ;;  %v1065_v34 = vpop.f32.mrb[37].mxu1  ;;  %1750 = vmatpush3.bf16.msra.mxu0 %v2280_v57 }
 0x288   :  { %v2321_v35 = vpack.c.bf16 %v1273_v27, %v1272_v26  ;;  %v1066_v36 = vadd.f32 %v2250_v45, %v1065_v34  ;;  %v1850_v38 = vpop.f32.mrb[38].mxu1 }
 0x289   :  { %v1214_v39 = vmul.f32 0.01, %v1074_v32  ;;  %v1077_v40 = vadd.f32 %v1850_v38, %v2250_v45  ;;  %v1068_v29 = vpop.f32.mrb[39].mxu1 }
 0x28a   :  { %v1212_v0 = vmul.f32 0.01, %v1066_v36  ;;  %v1069_v43 = vadd.f32 %v2250_v45, %v1068_v29  ;;  %1400 = vmatmul.mubr.bf16.vlgmr.msra.gmra.mrb[4].mxu0 %v2313_v30 }
 0x28b   :  { %v1215_v1 = vmul.f32 0.01, %v1077_v40  ;;  %1439 = vmatprep.mubr.bf16.mxu0 %v1362_v60  ;;  %v1278_v4 = vmax.f32 %v1074_v32, %v1214_v39 }
 0x28c   :  { %v1213_v57 = vmul.f32 0.01, %v1069_v43  ;;  %v1276_v44 = vmax.f32 %v1066_v36, %v1212_v0 }
 0x28d   :  { %v1279_v46 = vmax.f32 %v1077_v40, %v1215_v1 }
 0x28e   :  { %v1277_v47 = vmax.f32 %v1069_v43, %v1213_v57  ;;  %v1853_v48 = vpop.f32.mrb[40].mxu1 }
 0x28f   :  { %v2327_v49 = vpack.c.bf16 %v1279_v46, %v1278_v4  ;;  %v1090_v50 = vadd.f32 %v1853_v48, %v2250_v45  ;;  %v1081_v51 = vpop.f32.mrb[41].mxu1 }
 0x290   :  { %v2330_v63 = vpack.c.bf16 %v1277_v47, %v1276_v44  ;;  %v1082_v52 = vadd.f32 %v2250_v45, %v1081_v51  ;;  %v1854_v53 = vpop.f32.mrb[42].mxu1 }
 0x291   :  { %v1218_v54 = vmul.f32 0.01, %v1090_v50  ;;  %v1093_v55 = vadd.f32 %v1854_v53, %v2250_v45  ;;  %v1084_v56 = vpop.f32.mrb[43].mxu1 }
 0x292   :  { %v1216_v58 = vmul.f32 0.01, %v1082_v52  ;;  %v1085_v59 = vadd.f32 %v2250_v45, %v1084_v56 }
 0x293   :  { %v1219_v61 = vmul.f32 0.01, %v1093_v55  ;;  %v1282_v2 = vmax.f32 %v1090_v50, %v1218_v54 }
 0x294   :  { %v1217_v62 = vmul.f32 0.01, %v1085_v59  ;;  %v1280_v3 = vmax.f32 %v1082_v52, %v1216_v58 }
 0x295   :  { %v1283_v20 = vmax.f32 %v1093_v55, %v1219_v61 }
 0x296   :  { %v1281_v5 = vmax.f32 %v1085_v59, %v1217_v62  ;;  %v1857_v6 = vpop.f32.mrb[44].mxu1 }
 0x297   :  { %v2335_v7 = vpack.c.bf16 %v1283_v20, %v1282_v2  ;;  %v1106_v8 = vadd.f32 %v1857_v6, %v2250_v45  ;;  %v1097_v9 = vpop.f32.mrb[45].mxu1 }
 0x298   :  { %v2338_v42 = vpack.c.bf16 %v1281_v5, %v1280_v3  ;;  %v1098_v10 = vadd.f32 %v2250_v45, %v1097_v9  ;;  %v1858_v11 = vpop.f32.mrb[46].mxu1 }
 0x299   :  { %v1222_v12 = vmul.f32 0.01, %v1106_v8  ;;  %v1109_v13 = vadd.f32 %v1858_v11, %v2250_v45  ;;  %v1100_v14 = vpop.f32.mrb[47].mxu1 }
 0x29a   :  { %v1220_v15 = vmul.f32 0.01, %v1098_v10  ;;  %v1101_v16 = vadd.f32 %v2250_v45, %v1100_v14 }
 0x29b   :  { %v1223_v17 = vmul.f32 0.01, %v1109_v13  ;;  %v1286_v18 = vmax.f32 %v1106_v8, %v1222_v12 }
 0x29c   :  { %v1221_v41 = vmul.f32 0.01, %v1101_v16  ;;  %v1284_v19 = vmax.f32 %v1098_v10, %v1220_v15 }
 0x29d   :  { %v1287_v33 = vmax.f32 %v1109_v13, %v1223_v17 }
 0x29e   :  { %v1285_v21 = vmax.f32 %v1101_v16, %v1221_v41  ;;  %v1861_v22 = vpop.f32.mrb[48].mxu1 }
 0x29f   :  { %v2343_v23 = vpack.c.bf16 %v1287_v33, %v1286_v18  ;;  %v1122_v24 = vadd.f32 %v1861_v22, %v2250_v45  ;;  %v1113_v25 = vpop.f32.mrb[49].mxu1 }
 0x2a0   :  { %v2346_v37 = vpack.c.bf16 %v1285_v21, %v1284_v19  ;;  %v1114_v26 = vadd.f32 %v2250_v45, %v1113_v25  ;;  %v1862_v27 = vpop.f32.mrb[50].mxu1 }
 0x2a1   :  { %v1226_v28 = vmul.f32 0.01, %v1122_v24  ;;  %v1125_v32 = vadd.f32 %v1862_v27, %v2250_v45  ;;  %v1116_v34 = vpop.f32.mrb[51].mxu1 }
 0x2a2   :  { %v1224_v60 = vmul.f32 0.01, %v1114_v26  ;;  %v1117_v36 = vadd.f32 %v2250_v45, %v1116_v34 }
 0x2a3   :  { %v1227_v38 = vmul.f32 0.01, %v1125_v32  ;;  %v1290_v40 = vmax.f32 %v1122_v24, %v1226_v28 }
 0x2a4   :  { %v1225_v39 = vmul.f32 0.01, %v1117_v36  ;;  %v1288_v0 = vmax.f32 %v1114_v26, %v1224_v60 }
 0x2a5   :  { %v1291_v29 = vmax.f32 %v1125_v32, %v1227_v38 }
 0x2a6   :  { %v1289_v43 = vmax.f32 %v1117_v36, %v1225_v39  ;;  %v1865_v1 = vpop.f32.mrb[52].mxu1 }
 0x2a7   :  { %v1138_v57 = vadd.f32 %v1865_v1, %v2250_v45  ;;  %v1129_v4 = vpop.f32.mrb[53].mxu1  ;;  %v1331_v46 = vpack.c.bf16 %v1291_v29, %v1290_v40 }
 0x2a8   :  { %v1130_v44 = vadd.f32 %v2250_v45, %v1129_v4  ;;  %v1866_v47 = vpop.f32.mrb[54].mxu1  ;;  %v1330_v48 = vpack.c.bf16 %v1289_v43, %v1288_v0  ;;  %v1454_v0 = vld [vmem:[%s2452_s6] sm:$0xff]  ;;  %v1459_v4 = vld [vmem:[%s2452_s6 + $0x28] sm:$0xff] }
 0x2a9   :  { %v1230_v50 = vmul.f32 0.01, %v1138_v57  ;;  %v1141_v51 = vadd.f32 %v1866_v47, %v2250_v45  ;;  %v1132_v52 = vpop.f32.mrb[55].mxu1  ;;  %v1461_v47 = vld [vmem:[%s2452_s6 + $0x38] sm:$0xff] }
 0x2aa   :  { %v1228_v53 = vmul.f32 0.01, %v1130_v44  ;;  %v1133_v54 = vadd.f32 %v2250_v45, %v1132_v52  ;;  %1757 = vmatprep.subr.bf16.mxu0 %v1330_v48 }
 0x2ab   :  { %v1231_v55 = vmul.f32 0.01, %v1141_v51  ;;  %1758 = vmatpush3.bf16.msra.mxu0 %v2321_v35  ;;  %v1294_v58 = vmax.f32 %v1138_v57, %v1230_v50  ;;  %v1458_v57 = vld [vmem:[%s2452_s6 + $0x20] sm:$0xff] }
 0x2ac   :  { %v1229_v56 = vmul.f32 0.01, %v1133_v54  ;;  %1759 = vmatprep.subr.bf16.mxu0 %v1331_v46  ;;  %v1292_v61 = vmax.f32 %v1130_v44, %v1228_v53  ;;  %v1920_v46 = vpack.c.bf16 %v1459_v4, %v1458_v57  ;;  %v1460_v44 = vld [vmem:[%s2452_s6 + $0x30] sm:$0xff] }
 0x2ad   :  { %v1295_v59 = vmax.f32 %v1141_v51, %v1231_v55  ;;  %v1923_v48 = vpack.c.bf16 %v1461_v47, %v1460_v44 }
 0x2ae   :  { %v1293_v62 = vmax.f32 %v1133_v54, %v1229_v56  ;;  %v1869_v2 = vpop.f32.mrb[56].mxu1 }
 0x2af   :  { %v1154_v20 = vadd.f32 %v1869_v2, %v2250_v45  ;;  %v1145_v3 = vpop.f32.mrb[57].mxu1  ;;  %1760 = vmatpush3.bf16.msra.mxu0 %v2315_v31  ;;  %v1333_v5 = vpack.c.bf16 %v1295_v59, %v1294_v58 }
 0x2b0   :  { %v1146_v6 = vadd.f32 %v2250_v45, %v1145_v3  ;;  %v1870_v8 = vpop.f32.mrb[58].mxu1  ;;  %v1332_v9 = vpack.c.bf16 %v1293_v62, %v1292_v61  ;;  %v1544_v3 = vld [vmem:[%s2454_s8] sm:$0xff] }
 0x2b1   :  { %v1234_v10 = vmul.f32 0.01, %v1154_v20  ;;  %v1157_v35 = vadd.f32 %v1870_v8, %v2250_v45  ;;  %v1148_v11 = vpop.f32.mrb[59].mxu1  ;;  %v1546_v8 = vld [vmem:[%s2454_s8 + $0x10] sm:$0xff] }
 0x2b2   :  { %v1232_v12 = vmul.f32 0.01, %v1146_v6  ;;  %v1149_v13 = vadd.f32 %v2250_v45, %v1148_v11  ;;  %1761 = vmatprep.subr.bf16.mxu0 %v1332_v9  ;;  %v1547_v9 = vld [vmem:[%s2454_s8 + $0x18] sm:$0xff]  ;;  %v1548_v11 = vld [vmem:[%s2454_s8 + $0x20] sm:$0xff] }
 0x2b3   :  { %v1235_v14 = vmul.f32 0.01, %v1157_v35  ;;  %1762 = vmatpush3.bf16.msra.mxu0 %v2330_v63  ;;  %v1298_v16 = vmax.f32 %v1154_v20, %v1234_v10 }
 0x2b4   :  { %v1233_v15 = vmul.f32 0.01, %v1149_v13  ;;  %1763 = vmatprep.subr.bf16.mxu0 %v1333_v5  ;;  %v1296_v17 = vmax.f32 %v1146_v6, %v1232_v12  ;;  %v1545_v5 = vld [vmem:[%s2454_s8 + $0x8] sm:$0xff] }
 0x2b5   :  { %v1299_v31 = vmax.f32 %v1157_v35, %v1235_v14  ;;  %v1926_v6 = vpack.c.bf16 %v1545_v5, %v1544_v3  ;;  %v1929_v35 = vpack.c.bf16 %v1547_v9, %v1546_v8  ;;  %v1549_v12 = vld [vmem:[%s2454_s8 + $0x28] sm:$0xff] }
 0x2b6   :  { %v1297_v41 = vmax.f32 %v1149_v13, %v1233_v15  ;;  %v1873_v18 = vpop.f32.mrb[60].mxu1  ;;  %v1550_v13 = vld [vmem:[%s2454_s8 + $0x30] sm:$0xff]  ;;  %v1932_v14 = vpack.c.bf16 %v1549_v12, %v1548_v11  ;;  %v1551_v15 = vld [vmem:[%s2454_s8 + $0x38] sm:$0xff]  ;;  %s1984_s8 = smov [#allocation5]  }
 0x2b7   :  { %v1170_v33 = vadd.f32 %v1873_v18, %v2250_v45  ;;  %v1161_v19 = vpop.f32.mrb[61].mxu1  ;;  %1764 = vmatpush3.bf16.msra.mxu0 %v2327_v49  ;;  %v1335_v21 = vpack.c.bf16 %v1299_v31, %v1298_v16  ;;  %v1935_v16 = vpack.c.bf16 %v1551_v15, %v1550_v13  ;;  %v1692_v31 = vld [vmem:[%s2453_s7] ss:$0 sm:$0xff]  ;;  %s1641_s17 = sshll.u32 %s1984_s8, 4  ;;  %s1642_s17 = int_to_ptr.vmem [resolvable:$true] %s1641_s17 }
 0x2b8   :  { %v1162_v22 = vadd.f32 %v2250_v45, %v1161_v19  ;;  %v1874_v24 = vpop.f32.mrb[62].mxu1  ;;  %v1334_v25 = vpack.c.bf16 %v1297_v41, %v1296_v17  ;;  %s1954_s7 = scalar_lea.vmem %s1642_s17, 32  ;;  %p1959_p1 = scmp.lt.s32.totalorder %s1642_s17, %s1642_s17 }
 0x2b9   :  { %v1238_v26 = vmul.f32 0.01, %v1170_v33  ;;  %v1173_v63 = vadd.f32 %v1874_v24, %v2250_v45  ;;  %v1164_v27 = vpop.f32.mrb[63].mxu1  ;;  %p1955_p0 = scmp.ne.s32.totalorder %s1642_s17, %s1954_s7  ;;  %p1960_p2 = scmp.lt.s32.totalorder %s1954_s7, %s1954_s7 }
 0x2ba   :  { %v1236_v28 = vmul.f32 0.01, %v1162_v22  ;;  %v1165_v32 = vadd.f32 %v2250_v45, %v1164_v27  ;;  %1765 = vmatprep.subr.bf16.mxu0 %v1334_v25  ;;  %v1361_v45 = vcombine.high %v2313_v30, %v2313_v30  ;;  %v1457_v30 = vld [vmem:[%s2452_s6 + $0x18] sm:$0xff] }
 0x2bb   :  { %v1239_v34 = vmul.f32 0.01, %v1173_v63  ;;  %1766 = vmatpush3.bf16.msra.mxu0 %v2338_v42  ;;  %v1302_v36 = vmax.f32 %v1170_v33, %v1238_v26  ;;  %v1981_v42 = vmov 0.0|0.0   ;;  %p1961_p3 = por %p1960_p2, %p1959_p1 }
 0x2bc   :  { %v1237_v60 = vmul.f32 0.01, %v1165_v32  ;;  %1767 = vmatprep.subr.bf16.mxu0 %v1335_v21  ;;  %v1300_v38 = vmax.f32 %v1162_v22, %v1236_v28  ;;  %v1694_v21 = vld [vmem:[%s2455_s9] ss:$0 sm:$0xff] }
 0x2bd   :  { %v1303_v49 = vmax.f32 %v1173_v63, %v1239_v34  ;;  %p1962_p4 = pnand %p1961_p3, %p1955_p0 }
 0x2be   :  { %v1301_v39 = vmax.f32 %v1165_v32, %v1237_v60 }
 0x2bf   :  { %1768 = vmatpush3.bf16.msra.mxu0 %v2335_v7  ;;  %v1337_v40 = vpack.c.bf16 %v1303_v49, %v1302_v36  ;;  %v1455_v7 = vld [vmem:[%s2452_s6 + $0x8] sm:$0xff] }
 0x2c0   :  { %v1336_v29 = vpack.c.bf16 %v1301_v39, %v1300_v38  ;;  %v1914_v43 = vpack.c.bf16 %v1455_v7, %v1454_v0 }
 0x2c2   :  { %1769 = vmatprep.subr.bf16.mxu0 %v1336_v29 }
 0x2c3   :  { %1770 = vmatpush3.bf16.msra.mxu0 %v2346_v37  ;;  %v1456_v37 = vld [vmem:[%s2452_s6 + $0x10] sm:$0xff] }
 0x2c4   :  { %1771 = vmatprep.subr.bf16.mxu0 %v1337_v40  ;;  %v1917_v1 = vpack.c.bf16 %v1457_v30, %v1456_v37 }
 0x2c7   :  { %1772 = vmatpush3.bf16.msra.mxu0 %v2343_v23  ;;  %v1982_v23 = vmov 0.0  }
 0x2c8   :  { %1913 = vmatprep.subr.bf16.mxu0 %v1981_v42  ;;  %156 = vst.msk [vmem:[#allocation4] sm:$0x3] %vm155_vm4, %v1982_v23 }
 0x2ca   :  { %1440 = vmatmul.mubr.bf16.vlgmr.msra.gmra.mrb[8].mxu0 %v1361_v45 }
 0x2cb   :  { %1915 = vmatpush3.bf16.msra.mxu0 %v1914_v43  ;;  %1891 = vmatprep.mubr.msk.f32.mxu0 %vm1983_vm5, %v1982_v23 }
 0x2cc   :  { %1916 = vmatprep.subr.bf16.mxu0 %v1981_v42 }
 0x2cf   :  { %1918 = vmatpush3.bf16.msra.mxu0 %v1917_v1  ;;  %v1304_v62 = vld [vmem:[#allocation4] sm:$0x3] }
 0x2d0   :  { %1919 = vmatprep.subr.bf16.mxu0 %v1981_v42 }
 0x2d3   :  { %1921 = vmatpush3.bf16.msra.mxu0 %v1920_v46 }
 0x2d4   :  { %1922 = vmatprep.subr.bf16.mxu0 %v1981_v42 }
 0x2d7   :  { %1924 = vmatpush3.bf16.msra.mxu0 %v1923_v48 }
 0x2d8   :  { %1925 = vmatprep.subr.bf16.mxu0 %v1981_v42 }
 0x35d   :  { %v1751_v50 = vpop.f32.mrb[4].mxu0 }
 0x35e   :  { %v1752_v51 = vpop.f32.mrb[5].mxu0 }
 0x35f   :  { %v1753_v52 = vadd.f32 %v1752_v51, %v1751_v50  ;;  %v1754_v53 = vpop.f32.mrb[6].mxu0 }
 0x360   :  { %v1755_v54 = vpop.f32.mrb[7].mxu0 }
 0x39d   :  { %v1773_v55 = vpop.f32.mrb[8].mxu0 }
 0x39e   :  { %v1774_v56 = vpop.f32.mrb[9].mxu0 }
 0x39f   :  { %v1775_v58 = vadd.f32 %v1774_v56, %v1773_v55  ;;  %v1776_v59 = vpop.f32.mrb[10].mxu0 }
 0x3a0   :  { %v1777_v61 = vpop.f32.mrb[11].mxu0 }
 0x3a1   :  { %v1442_v2 = vadd.f32 %v1775_v58, %v1753_v52 }
 0x3a3   :  { %v1447_v20 = vadd.f32 %v1442_v2, %v1304_v62 }
 0x3a5   :  { %1449 = vst.msk [vmem:[#allocation4] sm:$0x3] %vm155_vm4, %v1447_v20 }
 0x3ac   :  { %v1453_v10 = vld [vmem:[#allocation4] sm:$0x3] }
 0x3ad   :  { %1892 = vmatmul.mubr.msk.f32.vlgmr.msra.gmra.mrb[12].mxu0 %vm130_vm3, %v1453_v10 }
 0x3ae   :  { %1927 = vmatpush3.bf16.msra.mxu0 %v1926_v6  ;;  %1910 = vmatprep.mubr.msk.f32.mxu0 %vm1983_vm5, %v1982_v23 }
 0x3af   :  { %1928 = vmatprep.subr.bf16.mxu0 %v1981_v42 }
 0x3b2   :  { %1930 = vmatpush3.bf16.msra.mxu0 %v1929_v35 }
 0x3b3   :  { %1931 = vmatprep.subr.bf16.mxu0 %v1981_v42 }
 0x3b6   :  { %1933 = vmatpush3.bf16.msra.mxu0 %v1932_v14 }
 0x3b7   :  { %1934 = vmatprep.subr.bf16.mxu0 %v1981_v42 }
 0x3ba   :  { %1936 = vmatpush3.bf16.msra.mxu0 %v1935_v16 }
 0x480   :  { %v1538_v17 = vpop.f32.mrb[12].mxu0 }
 0x481   :  { %v1539_v41 = vadd.f32 %v1692_v31, %v1538_v17  ;;  %v1893_v18 = vpop.f32.mrb[13].mxu0 }
 0x483   :  { %v1542_v33 = vmul.f32 0.01, %v1539_v41 }
 0x485   :  { %v1543_v19 = vmax.f32 %v1539_v41, %v1542_v33 }
 0x487   :  { %1911 = vmatmul.mubr.msk.f32.vlgmr.msra.gmra.mrb[14].mxu0 %vm130_vm3, %v1543_v19 }
 0x55a   :  { %v1628_v22 = vpop.f32.mrb[14].mxu0 }
 0x55b   :  { %v1629_v24 = vadd.f32 %v1694_v21, %v1628_v22  ;;  %v1912_v25 = vpop.f32.mrb[15].mxu0 }
 0x55d   :  { %v1632_v26 = vmul.f32 0.01, %v1629_v24 }
 0x55f   :  { %v1633_v63 = vmax.f32 %v1629_v24, %v1632_v26 }
 0x561   :  { %1634 = vst.msk [vmem:[#allocation5] sm:$0x3] %vm155_vm4, %v1633_v63 }
 0x562   :  { %1965 = shalt.err (!%p1962_p4)
}
 0x563   :  { %s1966_s9 = scalar_lea.hbm %s2456_s10, 32 }
 0x564   :  { %p1967_p5 = scmp.ne.s32.totalorder %s2456_s10, %s1966_s9  ;;  %p1970_p6 = scmp.lt.u32.totalorder %s1966_s9, %s2456_s10 }
 0x566   :  { %p1972_p7 = pnand %p1970_p6, %p1967_p5 }
 0x568   :  { %1975 = shalt.err (!%p1972_p7)
}
 0x569   :  { %1644 = dma.vmem_to_hbm [thread:$0]  %s1642_s17, 32, %s2456_s10, [#allocation6]  }
 0x56a   :  { %1976 = dma.done.wait [#allocation6], 32  }
 0x56b   :  { %1977 = vsyncadd [#allocation6], 4294967264 }
 0x56c   :  { %1648 = vsyncpa [#allocation6], 1 }

</bundles_post_ra>
